<compile_context>
chip_gen: v7x
topology: tpu7x:2x2x1
jax: 0.10.0
libtpu: 0.0.40
codegen_flags: <defaults>
</compile_context>

<pallas_src>
import functools

import jax
import jax.numpy as jnp
from jax import lax
from jax.experimental import pallas as pl
from jax.experimental.pallas import tpu as pltpu

_BN_EPS = 1e-5


# ------------------------------- small helpers ---------------------------------

def _round_up(x, m):
    return (x + m - 1) // m * m


def _vmem_capacity_bytes():
    """Physical VMEM of the local TPU generation (fallback: v7x's 64 MiB/TC)."""
    try:
        return int(pltpu.get_tpu_info().vmem_capacity_bytes)
    except Exception:
        return 64 * 2**20


def _vmem_budgets():
    cap = _vmem_capacity_bytes()
    limit_cap = int(0.75 * cap)                  # never request more than ~75% VMEM
    tile_budget = min(limit_cap, 32 * 2**20)     # working-set target when picking bt
    return tile_budget, limit_cap


def _mha_vmem_bytes(bt, n, dp, n_heads, has_mask, w_bytes):
    """VMEM working-set estimate of the MHA kernel for one (bt, n, dp) block."""
    act = bt * n * dp
    blk16, blk32 = 2 * act, 4 * act
    sc32 = n_heads * bt * n * n * 4              # batched (H*bt, n, n) f32 scores
    io = 2 * blk16 + 2 * blk16 + 4 * (dp * 4)    # x in / h out (dbl-buffered) + stats
    if has_mask:
        io += 2 * bt * n * n                     # bool mask (dbl-buffered)
    work = (blk32                                # BN-applied x (f32)
            + 3 * blk32                          # fused qkv (f32)
            + 3 * blk16 + 3 * blk16              # q/k/v bf16 + head-major stacks
            + 2 * sc32 + sc32 // 2               # scores, exp (f32), probs (bf16)
            + 4 * blk32)                         # ctx, heads_cat, out, y (f32)
    return io + 2 * w_bytes + work + (2 << 20)


def _batch_tile(b, n, dp, n_heads, has_mask, w_bytes, budget, min_steps):
    """Largest divisor bt of b fitting the VMEM budget with >= min_steps grid
    steps (keeps both v7x TensorCores busy when b > 1)."""
    best = 1
    for bt in range(1, b + 1):
        if b % bt or b // bt < min_steps:
            continue
        if _mha_vmem_bytes(bt, n, dp, n_heads, has_mask, w_bytes) <= budget:
            best = bt
    return best


def _row_tile(m, target=8192):
    """Largest nicely-aligned divisor of m that is <= target (m itself if small)."""
    if m <= target:
        return m
    for align in (128, 16, 8):
        t = (target // align) * align
        while t >= align:
            if m % t == 0:
                return t
            t -= align
    return m


# --------- fused (prev-layer BN affine) + MHA + skip + ReLU + BN-stats kernel ---

def _mha_kernel(*refs, n_heads, dk_pad, key_dim, has_mask):
    if has_mask:
        (x_ref, scale_ref, shift_ref, wqkv_ref, wo_ref, mask_ref,
         o_ref, sum_ref, sq_ref) = refs
    else:
        (x_ref, scale_ref, shift_ref, wqkv_ref, wo_ref,
         o_ref, sum_ref, sq_ref) = refs
        mask_ref = None

    bt, n, dp = x_ref.shape
    dkp = dk_pad

    # Fused BatchNorm affine of the previous layer (identity for layer 0);
    # residual path and statistics stay in f32.
    x = x_ref[...].astype(jnp.float32) * scale_ref[...] + shift_ref[...]

    # Single fused QKV projection: bf16 in, f32 accumulate on the MXU.
    xb = x.reshape(bt * n, dp).astype(jnp.bfloat16)
    qkv = jnp.dot(xb, wqkv_ref[...],
                  preferred_element_type=jnp.float32).reshape(bt, n, 3 * dp)
    q = qkv[..., :dp].astype(jnp.bfloat16)          # 128-lane aligned slices
    k = qkv[..., dp:2 * dp].astype(jnp.bfloat16)
    v = qkv[..., 2 * dp:].astype(jnp.bfloat16)

    # Head-major restructuring via static 16-lane slices + a leading-axis stack
    # (major-dim concat, no 4-D transpose primitive), so scores / softmax / PV
    # run as single batched ops over all heads.
    def head_major(t):
        return jnp.stack([t[..., h * dkp:(h + 1) * dkp] for h in range(n_heads)],
                         axis=0).reshape(n_heads * bt, n, dkp)

    qh, kh, vh = head_major(q), head_major(k), head_major(v)

    inv_sqrt_dk = 1.0 / (key_dim ** 0.5)            # original (unpadded) head dim
    scores = inv_sqrt_dk * jnp.einsum('bnd,bmd->bnm', qh, kh,
                                      preferred_element_type=jnp.float32)
    if mask_ref is not None:
        neg = jnp.where(mask_ref[...], -1e9, 0.0)   # (bt, n, n) f32, built in-kernel
        scores = (scores.reshape(n_heads, bt, n, n) + neg[None]
                  ).reshape(n_heads * bt, n, n)
    scores = scores - jnp.max(scores, axis=-1, keepdims=True)
    e = jnp.exp(scores)
    # Exact reciprocal: approx=True trades ~1e-2 end-to-end accuracy for speed.
    p = (e * pl.reciprocal(jnp.sum(e, axis=-1, keepdims=True))
         ).astype(jnp.bfloat16)
    ctx = jnp.einsum('bnm,bmd->bnd', p, vh,
                     preferred_element_type=jnp.float32)       # (H*bt, n, dkp)
    ctx = ctx.reshape(n_heads, bt, n, dkp)
    heads_cat = jnp.concatenate([ctx[h] for h in range(n_heads)], axis=-1)

    # Single fused output projection (K = Dp).
    out = jnp.dot(heads_cat.reshape(bt * n, dp).astype(jnp.bfloat16), wo_ref[...],
                  preferred_element_type=jnp.float32).reshape(bt, n, dp)

    y = jnp.maximum(x + out, 0.0)                   # skip + ReLU in f32
    yb = y.astype(jnp.bfloat16)
    o_ref[...] = yb                                 # bf16 inter-layer activation

    # Fused per-block BatchNorm statistics (taken on exactly the stored values).
    y32 = yb.astype(jnp.float32).reshape(bt * n, dp)
    sum_ref[...] = jnp.sum(y32, axis=0).reshape(1, 1, dp)
    sq_ref[...] = jnp.sum(y32 * y32, axis=0).reshape(1, 1, dp)


def mha_layer(x, scale, shift, wqkv, wo, mask, *, n_heads, dk_pad, key_dim):
    b, n, dp = x.shape
    has_mask = mask is not None
    w_bytes = wqkv.size * wqkv.dtype.itemsize + wo.size * wo.dtype.itemsize

    tile_budget, limit_cap = _vmem_budgets()
    min_steps = 2 if b > 1 else 1        # >= 2 grid steps -> v7x 2nd TC has work
    bt = _batch_tile(b, n, dp, n_heads, has_mask, w_bytes, tile_budget, min_steps)
    g = b // bt

    kern = functools.partial(_mha_kernel, n_heads=n_heads, dk_pad=dk_pad,
                             key_dim=key_dim, has_mask=has_mask)

    in_specs = [
        pl.BlockSpec((bt, n, dp), lambda i: (i, 0, 0)),     # x (bf16 stream)
        pl.BlockSpec((1, dp), lambda i: (0, 0)),            # scale
        pl.BlockSpec((1, dp), lambda i: (0, 0)),            # shift
        pl.BlockSpec(wqkv.shape, lambda i: (0, 0)),
        pl.BlockSpec(wo.shape, lambda i: (0, 0)),
    ]
    args = [x, scale.reshape(1, dp), shift.reshape(1, dp), wqkv, wo]
    if has_mask:
        in_specs.append(pl.BlockSpec((bt, n, n), lambda i: (i, 0, 0)))
        args.append(mask)

    est = _mha_vmem_bytes(bt, n, dp, n_heads, has_mask, w_bytes)
    vmem_limit = int(min(max(est, 4 * 2**20), limit_cap))

    return pl.pallas_call(
        kern,
        out_shape=(jax.ShapeDtypeStruct((b, n, dp), jnp.bfloat16),   # h (bf16)
                   jax.ShapeDtypeStruct((g, 1, dp), jnp.float32),    # partial sum
                   jax.ShapeDtypeStruct((g, 1, dp), jnp.float32)),   # partial sumsq
        grid=(g,),
        in_specs=in_specs,
        out_specs=(pl.BlockSpec((bt, n, dp), lambda i: (i, 0, 0)),
                   pl.BlockSpec((1, 1, dp), lambda i: (i, 0, 0)),
                   pl.BlockSpec((1, 1, dp), lambda i: (i, 0, 0))),
        compiler_params=pltpu.CompilerParams(
            dimension_semantics=("parallel",),
            vmem_limit_bytes=vmem_limit),
    )(*args)


# ---------------------- BN folding + final affine-apply kernel ------------------

def _bn_affine(psum, psq, m, gamma_p, beta_p):
    """Fold (sum, sumsq) into per-feature scale/shift (tiny plain-JAX math)."""
    mean = psum / m
    var = jnp.maximum(psq / m - mean * mean, 0.0)
    inv = lax.rsqrt(var + _BN_EPS)
    scale = gamma_p * inv
    shift = beta_p - mean * scale
    return scale, shift


def _affine_kernel(x_ref, scale_ref, shift_ref, o_ref):
    o_ref[...] = (x_ref[...].astype(jnp.float32) * scale_ref[...]
                  + shift_ref[...]).astype(o_ref.dtype)


def affine_apply(x_flat, scale, shift):
    m, dp = x_flat.shape
    tm = _row_tile(m)
    return pl.pallas_call(
        _affine_kernel,
        out_shape=jax.ShapeDtypeStruct((m, dp), jnp.float32),
        grid=(m // tm,),
        in_specs=[pl.BlockSpec((tm, dp), lambda i: (i, 0)),
                  pl.BlockSpec((1, dp), lambda i: (0, 0)),
                  pl.BlockSpec((1, dp), lambda i: (0, 0))],
        out_specs=pl.BlockSpec((tm, dp), lambda i: (i, 0)),
        compiler_params=pltpu.CompilerParams(
            dimension_semantics=("parallel",)),
    )(x_flat, scale.reshape(1, dp), shift.reshape(1, dp))


# ------------------------- parameter packing (host side) -----------------------

def pack_params(params, n_heads):
    """Pad heads to 16 lanes (D 96 -> 128), fuse Wq/Wk/Wv, pre-cast to bf16."""
    w_coord = params["w_coord"]
    e = w_coord.shape[1]
    d = 3 * e
    dk = d // n_heads
    assert 128 % n_heads == 0, "head-padding scheme assumes n_heads divides 128"
    dk_p = _round_up(dk, 128 // n_heads)
    dp = n_heads * dk_p

    def pad_in_w(w):        # (d, d), columns grouped per head -> (dp, dp)
        w3 = w.reshape(d, n_heads, dk)
        out = jnp.zeros((dp, n_heads, dk_p), jnp.float32)
        out = out.at[:d, :, :dk].set(w3)
        return out.reshape(dp, dp)

    def pad_out_w(w):       # (d, d), rows grouped per head -> (dp, dp)
        w3 = w.reshape(n_heads, dk, d)
        out = jnp.zeros((n_heads, dk_p, dp), jnp.float32)
        out = out.at[:, :dk, :d].set(w3)
        return out.reshape(dp, dp)

    layers = []
    for lp in params["layers"]:
        wqkv = jnp.concatenate(
            [pad_in_w(lp["wq"]), pad_in_w(lp["wk"]), pad_in_w(lp["wv"])],
            axis=1).astype(jnp.bfloat16)                      # (dp, 3*dp)
        wo = pad_out_w(lp["wo"]).astype(jnp.bfloat16)         # (dp, dp)
        # Padding lanes get gamma=beta=0 -> their BN affine is exactly 0,
        # keeping the padded lanes at 0 across layers (no rsqrt(eps) blow-up).
        gamma_p = jnp.concatenate([lp["gamma"], jnp.zeros((dp - d,), jnp.float32)])
        beta_p = jnp.concatenate([lp["beta"], jnp.zeros((dp - d,), jnp.float32)])
        layers.append({"wqkv": wqkv, "wo": wo, "gamma": gamma_p, "beta": beta_p})

    return {"w_coord": w_coord, "embed_table": params["embed_table"],
            "d": d, "dp": dp, "dk": dk, "dk_pad": dk_p, "n_heads": n_heads,
            "layers": layers}


# --------------------------------- encoder forward ------------------------------

def graph_attention_encoder(packed, coord, flag, pos, attention_mask=None):
    b, n, _ = coord.shape
    d, dp = packed["d"], packed["dp"]
    n_heads, dk, dk_p = packed["n_heads"], packed["dk"], packed["dk_pad"]

    # Embedding glue in plain JAX: the (B*N, 2) x (2, E) matmul is MXU-useless
    # and the table gathers have no dense Pallas hot path.
    ce = jnp.einsum('bnc,ce->bne', coord, packed["w_coord"])
    fe = jnp.take(packed["embed_table"], flag, axis=0)
    pe = jnp.take(packed["embed_table"], pos, axis=0)
    h = jnp.concatenate([ce, fe, pe], axis=-1)                 # (B, N, D) f32
    h = jnp.pad(h, ((0, 0), (0, 0), (0, dp - d)))              # lane-dense Dp
    h = h.astype(jnp.bfloat16)                                 # bf16 activations

    # Mask streamed as bool; True == masked out (score -> -1e9).  A fully
    # masked row degenerates to uniform attention (finite, no inf/NaN).
    mask = None if attention_mask is None else attention_mask.astype(jnp.bool_)

    m = b * n
    scale = jnp.ones((dp,), jnp.float32)     # identity pre-affine for layer 0
    shift = jnp.zeros((dp,), jnp.float32)
    for lp in packed["layers"]:
        # h <- relu(x + MHA(x)) with x = scale*h + shift (prev layer's BN, fused);
        # BatchNorm partial statistics come out of the same kernel.
        h, psum, psq = mha_layer(h, scale, shift, lp["wqkv"], lp["wo"], mask,
                                 n_heads=n_heads, dk_pad=dk_p, key_dim=dk)
        scale, shift = _bn_affine(jnp.sum(psum, axis=(0, 1)),
                                  jnp.sum(psq, axis=(0, 1)),
                                  m, lp["gamma"], lp["beta"])

    # Apply the final layer's BatchNorm affine and strip the padding lanes.
    h = affine_apply(h.reshape(m, dp), scale, shift).reshape(b, n, dp)
    return h[..., :d]


# ------------------------------- pure-JAX reference -----------------------------

def encoder_ref(params, coord, flag, pos, n_heads=8):
    """Mirrors the kernel's precision choices (bf16 matmul inputs, bf16
    inter-layer activation storage, f32 accumulation and statistics)."""
    bf = lambda a: a.astype(jnp.bfloat16).astype(jnp.float32)
    B, N, _ = coord.shape
    E = params["w_coord"].shape[1]
    D = 3 * E
    dk = D // n_heads

    ce = jnp.einsum('bnc,ce->bne', coord, params["w_coord"])
    fe = params["embed_table"][flag]
    pe = params["embed_table"][pos]
    h = bf(jnp.concatenate([ce, fe, pe], axis=2))          # bf16 storage

    scale = jnp.ones((D,), jnp.float32)
    shift = jnp.zeros((D,), jnp.float32)
    for lp in params["layers"]:
        x = h * scale + shift                              # fused prev-layer BN
        xb = bf(x)
        q = bf(jnp.einsum('bnd,de->bne', xb, bf(lp["wq"]))).reshape(B, N, n_heads, dk)
        k = bf(jnp.einsum('bnd,de->bne', xb, bf(lp["wk"]))).reshape(B, N, n_heads, dk)
        v = bf(jnp.einsum('bnd,de->bne', xb, bf(lp["wv"]))).reshape(B, N, n_heads, dk)
        compat = jnp.einsum('bnhd,bmhd->bhnm', q, k) / jnp.sqrt(jnp.float32(dk))
        attn = bf(jax.nn.softmax(compat, axis=-1))
        heads = jnp.einsum('bhnm,bmhd->bnhd', attn, v).reshape(B, N, D)
        y = jax.nn.relu(x + jnp.einsum('bnd,de->bne', bf(heads), bf(lp["wo"])))
        h = bf(y)                                          # bf16 inter-layer storage
        xf = h.reshape(B * N, D)
        mean = xf.mean(0)
        var = jnp.square(xf - mean[None, :]).mean(0)
        inv = lax.rsqrt(var + _BN_EPS)
        scale = lp["gamma"] * inv
        shift = lp["beta"] - mean * scale
    return h * scale + shift


# --------------------------------------- main -----------------------------------

if __name__ == "__main__":
    B, N = 2, 8
    coord_input_dim, feat_dict_size = 2, 16
    embed_dim, n_heads, n_layers = 32, 8, 2
    D = 3 * embed_dim

    key = jax.random.PRNGKey(0)
    keys = jax.random.split(key, 5 + 6 * n_layers)

    params = {
        "w_coord": 0.1 * jax.random.normal(keys[0], (coord_input_dim, embed_dim),
                                           jnp.float32),
        "embed_table": 0.1 * jax.random.normal(keys[1], (feat_dict_size, embed_dim),
                                               jnp.float32),
        "layers": [],
    }
    for l in range(n_layers):
        kq, kk, kv, ko, kg, kb = keys[2 + 6 * l: 2 + 6 * (l + 1)]
        params["layers"].append({
            "wq": 0.1 * jax.random.normal(kq, (D, D), jnp.float32),
            "wk": 0.1 * jax.random.normal(kk, (D, D), jnp.float32),
            "wv": 0.1 * jax.random.normal(kv, (D, D), jnp.float32),
            "wo": 0.1 * jax.random.normal(ko, (D, D), jnp.float32),
            "gamma": 1.0 + 0.1 * jax.random.normal(kg, (D,), jnp.float32),
            "beta": 0.1 * jax.random.normal(kb, (D,), jnp.float32),
        })

    kc, kf, kp = jax.random.split(keys[-1], 3)
    coord = jax.random.normal(kc, (B, N, coord_input_dim), jnp.float32)
    flag = jax.random.randint(kf, (B, N), 0, feat_dict_size, jnp.int32)
    pos = jax.random.randint(kp, (B, N), 0, feat_dict_size, jnp.int32)

    packed = pack_params(params, n_heads)
    fwd = jax.jit(lambda c, f, p: graph_attention_encoder(packed, c, f, p,
                                                          attention_mask=None))
    out = jax.block_until_ready(fwd(coord, flag, pos))

    ref = encoder_ref(params, coord, flag, pos, n_heads=n_heads)
    assert out.shape == (B, N, D)
    max_err = float(jnp.max(jnp.abs(out - ref)))
    assert jnp.allclose(out, ref, atol=1e-2, rtol=1e-2), f"max abs err {max_err}"

    print("KERNEL_OK")
</pallas_src>

<mosaic_0001>
module attributes {stable_mosaic.version = 11 : i64} {
  func.func @_affine_kernel(%arg0: i32, %arg1: memref<16x128xbf16, #tpu.memory_space<vmem>>, %arg2: memref<1x128xf32, #tpu.memory_space<vmem>>, %arg3: memref<1x128xf32, #tpu.memory_space<vmem>>, %arg4: memref<16x128xf32, #tpu.memory_space<vmem>>) attributes {dimension_semantics = [#tpu.dimension_semantics<parallel>], iteration_bounds = array<i64: 1>, scalar_prefetch = 0 : i64, scratch_operands = 0 : i64, tpu.core_type = #tpu.core_type<tc>, window_params = [{transform_indices = @transform_0, window_bounds = array<i64: 16, 128>}, {pipeline_mode = #tpu.pipeline_mode<synchronous>, transform_indices = @transform_1, window_bounds = array<i64: 1, 128>}, {pipeline_mode = #tpu.pipeline_mode<synchronous>, transform_indices = @transform_2, window_bounds = array<i64: 1, 128>}, {transform_indices = @transform_3, window_bounds = array<i64: 16, 128>}]} {
    %c0 = arith.constant 0 : index
    %c0_0 = arith.constant 0 : index
    %0 = vector.load %arg1[%c0, %c0_0] : memref<16x128xbf16, #tpu.memory_space<vmem>>, vector<16x128xbf16>
    %1 = arith.extf %0 : vector<16x128xbf16> to vector<16x128xf32>
    %c0_1 = arith.constant 0 : index
    %c0_2 = arith.constant 0 : index
    %2 = vector.load %arg2[%c0_1, %c0_2] : memref<1x128xf32, #tpu.memory_space<vmem>>, vector<1x128xf32>
    %3 = vector.broadcast %2 : vector<1x128xf32> to vector<16x128xf32>
    %4 = arith.mulf %1, %3 : vector<16x128xf32>
    %c0_3 = arith.constant 0 : index
    %c0_4 = arith.constant 0 : index
    %5 = vector.load %arg3[%c0_3, %c0_4] : memref<1x128xf32, #tpu.memory_space<vmem>>, vector<1x128xf32>
    %6 = vector.broadcast %5 : vector<1x128xf32> to vector<16x128xf32>
    %7 = arith.addf %4, %6 : vector<16x128xf32>
    %c0_5 = arith.constant 0 : index
    %c0_6 = arith.constant 0 : index
    %8 = vector.load %arg4[%c0_5, %c0_6] : memref<16x128xf32, #tpu.memory_space<vmem>>, vector<16x128xf32>
    tpu.vector_store %arg4[%c0_5, %c0_6], %7 {strides = array<i32>} : memref<16x128xf32, #tpu.memory_space<vmem>>, vector<16x128xf32>,
    return
  }
  func.func @transform_0(%arg0: i32) -> (i32, i32) {
    %c0_i32 = arith.constant 0 : i32
    %c0_i32_0 = arith.constant 0 : i32
    return %arg0, %c0_i32 : i32, i32
  }
  func.func @transform_1(%arg0: i32) -> (i32, i32) {
    %c0_i32 = arith.constant 0 : i32
    %c0_i32_0 = arith.constant 0 : i32
    %c0_i32_1 = arith.constant 0 : i32
    return %c0_i32, %c0_i32_0 : i32, i32
  }
  func.func @transform_2(%arg0: i32) -> (i32, i32) {
    %c0_i32 = arith.constant 0 : i32
    %c0_i32_0 = arith.constant 0 : i32
    %c0_i32_1 = arith.constant 0 : i32
    return %c0_i32, %c0_i32_0 : i32, i32
  }
  func.func @transform_3(%arg0: i32) -> (i32, i32) {
    %c0_i32 = arith.constant 0 : i32
    %c0_i32_0 = arith.constant 0 : i32
    return %arg0, %c0_i32 : i32, i32
  }
}

module attributes {stable_mosaic.version = 11 : i64} {
  func.func @_mha_kernel(%arg0: i32, %arg1: memref<1x8x128xbf16, #tpu.memory_space<vmem>>, %arg2: memref<1x128xf32, #tpu.memory_space<vmem>>, %arg3: memref<1x128xf32, #tpu.memory_space<vmem>>, %arg4: memref<128x384xbf16, #tpu.memory_space<vmem>>, %arg5: memref<128x128xbf16, #tpu.memory_space<vmem>>, %arg6: memref<1x8x128xbf16, #tpu.memory_space<vmem>>, %arg7: memref<1x1x128xf32, #tpu.memory_space<vmem>>, %arg8: memref<1x1x128xf32, #tpu.memory_space<vmem>>) attributes {dimension_semantics = [#tpu.dimension_semantics<parallel>], iteration_bounds = array<i64: 2>, scalar_prefetch = 0 : i64, scratch_operands = 0 : i64, tpu.core_type = #tpu.core_type<tc>, window_params = [{transform_indices = @transform_0, window_bounds = array<i64: 1, 8, 128>}, {pipeline_mode = #tpu.pipeline_mode<synchronous>, transform_indices = @transform_1, window_bounds = array<i64: 1, 128>}, {pipeline_mode = #tpu.pipeline_mode<synchronous>, transform_indices = @transform_2, window_bounds = array<i64: 1, 128>}, {pipeline_mode = #tpu.pipeline_mode<synchronous>, transform_indices = @transform_3, window_bounds = array<i64: 128, 384>}, {pipeline_mode = #tpu.pipeline_mode<synchronous>, transform_indices = @transform_4, window_bounds = array<i64: 128, 128>}, {transform_indices = @transform_5, window_bounds = array<i64: 1, 8, 128>}, {transform_indices = @transform_6, window_bounds = array<i64: 1, 1, 128>}, {transform_indices = @transform_7, window_bounds = array<i64: 1, 1, 128>}]} {
    %c0 = arith.constant 0 : index
    %c0_0 = arith.constant 0 : index
    %c0_1 = arith.constant 0 : index
    %0 = vector.load %arg1[%c0, %c0_0, %c0_1] : memref<1x8x128xbf16, #tpu.memory_space<vmem>>, vector<1x8x128xbf16>
    %1 = arith.extf %0 : vector<1x8x128xbf16> to vector<1x8x128xf32>
    %c0_2 = arith.constant 0 : index
    %c0_3 = arith.constant 0 : index
    %2 = vector.load %arg2[%c0_2, %c0_3] : memref<1x128xf32, #tpu.memory_space<vmem>>, vector<1x128xf32>
    %3 = vector.shape_cast %2 : vector<1x128xf32> to vector<1x1x128xf32>
    %4 = vector.broadcast %3 : vector<1x1x128xf32> to vector<1x8x128xf32>
    %5 = arith.mulf %1, %4 : vector<1x8x128xf32>
    %c0_4 = arith.constant 0 : index
    %c0_5 = arith.constant 0 : index
    %6 = vector.load %arg3[%c0_4, %c0_5] : memref<1x128xf32, #tpu.memory_space<vmem>>, vector<1x128xf32>
    %7 = vector.shape_cast %6 : vector<1x128xf32> to vector<1x1x128xf32>
    %8 = vector.broadcast %7 : vector<1x1x128xf32> to vector<1x8x128xf32>
    %9 = arith.addf %5, %8 : vector<1x8x128xf32>
    %10 = vector.shape_cast %9 : vector<1x8x128xf32> to vector<8x128xf32>
    %11 = arith.truncf %10 : vector<8x128xf32> to vector<8x128xbf16>
    %c0_6 = arith.constant 0 : index
    %c0_7 = arith.constant 0 : index
    %12 = vector.load %arg4[%c0_6, %c0_7] : memref<128x384xbf16, #tpu.memory_space<vmem>>, vector<128x384xbf16>
    %cst = arith.constant dense<0.000000e+00> : vector<8x384xf32>
    %13 = tpu.matmul %11, %12, %cst {dimension_numbers = #tpu.dot_dimension_numbers<[1], [0], [0], [1], [0, 0, 1, 1], [], []>} : vector<8x128xbf16>, vector<128x384xbf16>, vector<8x384xf32> -> vector<8x384xf32>
    %14 = vector.shape_cast %13 : vector<8x384xf32> to vector<1x8x384xf32>
    %15 = vector.extract_strided_slice %14 {offsets = [0, 0, 0], sizes = [1, 8, 128], strides = [1, 1, 1]} : vector<1x8x384xf32> to vector<1x8x128xf32>
    %16 = arith.truncf %15 : vector<1x8x128xf32> to vector<1x8x128xbf16>
    %17 = vector.extract_strided_slice %14 {offsets = [0, 0, 128], sizes = [1, 8, 128], strides = [1, 1, 1]} : vector<1x8x384xf32> to vector<1x8x128xf32>
    %18 = arith.truncf %17 : vector<1x8x128xf32> to vector<1x8x128xbf16>
    %19 = vector.extract_strided_slice %14 {offsets = [0, 0, 256], sizes = [1, 8, 128], strides = [1, 1, 1]} : vector<1x8x384xf32> to vector<1x8x128xf32>
    %20 = arith.truncf %19 : vector<1x8x128xf32> to vector<1x8x128xbf16>
    %21 = vector.extract_strided_slice %16 {offsets = [0, 0, 0], sizes = [1, 8, 16], strides = [1, 1, 1]} : vector<1x8x128xbf16> to vector<1x8x16xbf16>
    %22 = vector.extract_strided_slice %16 {offsets = [0, 0, 16], sizes = [1, 8, 16], strides = [1, 1, 1]} : vector<1x8x128xbf16> to vector<1x8x16xbf16>
    %23 = vector.extract_strided_slice %16 {offsets = [0, 0, 32], sizes = [1, 8, 16], strides = [1, 1, 1]} : vector<1x8x128xbf16> to vector<1x8x16xbf16>
    %24 = vector.extract_strided_slice %16 {offsets = [0, 0, 48], sizes = [1, 8, 16], strides = [1, 1, 1]} : vector<1x8x128xbf16> to vector<1x8x16xbf16>
    %25 = vector.extract_strided_slice %16 {offsets = [0, 0, 64], sizes = [1, 8, 16], strides = [1, 1, 1]} : vector<1x8x128xbf16> to vector<1x8x16xbf16>
    %26 = vector.extract_strided_slice %16 {offsets = [0, 0, 80], sizes = [1, 8, 16], strides = [1, 1, 1]} : vector<1x8x128xbf16> to vector<1x8x16xbf16>
    %27 = vector.extract_strided_slice %16 {offsets = [0, 0, 96], sizes = [1, 8, 16], strides = [1, 1, 1]} : vector<1x8x128xbf16> to vector<1x8x16xbf16>
    %28 = vector.extract_strided_slice %16 {offsets = [0, 0, 112], sizes = [1, 8, 16], strides = [1, 1, 1]} : vector<1x8x128xbf16> to vector<1x8x16xbf16>
    %29 = vector.shape_cast %21 : vector<1x8x16xbf16> to vector<1x1x8x16xbf16>
    %30 = vector.shape_cast %22 : vector<1x8x16xbf16> to vector<1x1x8x16xbf16>
    %31 = vector.shape_cast %23 : vector<1x8x16xbf16> to vector<1x1x8x16xbf16>
    %32 = vector.shape_cast %24 : vector<1x8x16xbf16> to vector<1x1x8x16xbf16>
    %33 = vector.shape_cast %25 : vector<1x8x16xbf16> to vector<1x1x8x16xbf16>
    %34 = vector.shape_cast %26 : vector<1x8x16xbf16> to vector<1x1x8x16xbf16>
    %35 = vector.shape_cast %27 : vector<1x8x16xbf16> to vector<1x1x8x16xbf16>
    %36 = vector.shape_cast %28 : vector<1x8x16xbf16> to vector<1x1x8x16xbf16>
    %37 = tpu.concatenate %29, %30, %31, %32, %33, %34, %35, %36 in 0 : vector<1x1x8x16xbf16>, vector<1x1x8x16xbf16>, vector<1x1x8x16xbf16>, vector<1x1x8x16xbf16>, vector<1x1x8x16xbf16>, vector<1x1x8x16xbf16>, vector<1x1x8x16xbf16>, vector<1x1x8x16xbf16> -> vector<8x1x8x16xbf16>
    %38 = vector.shape_cast %37 : vector<8x1x8x16xbf16> to vector<8x8x16xbf16>
    %39 = vector.extract_strided_slice %18 {offsets = [0, 0, 0], sizes = [1, 8, 16], strides = [1, 1, 1]} : vector<1x8x128xbf16> to vector<1x8x16xbf16>
    %40 = vector.extract_strided_slice %18 {offsets = [0, 0, 16], sizes = [1, 8, 16], strides = [1, 1, 1]} : vector<1x8x128xbf16> to vector<1x8x16xbf16>
    %41 = vector.extract_strided_slice %18 {offsets = [0, 0, 32], sizes = [1, 8, 16], strides = [1, 1, 1]} : vector<1x8x128xbf16> to vector<1x8x16xbf16>
    %42 = vector.extract_strided_slice %18 {offsets = [0, 0, 48], sizes = [1, 8, 16], strides = [1, 1, 1]} : vector<1x8x128xbf16> to vector<1x8x16xbf16>
    %43 = vector.extract_strided_slice %18 {offsets = [0, 0, 64], sizes = [1, 8, 16], strides = [1, 1, 1]} : vector<1x8x128xbf16> to vector<1x8x16xbf16>
    %44 = vector.extract_strided_slice %18 {offsets = [0, 0, 80], sizes = [1, 8, 16], strides = [1, 1, 1]} : vector<1x8x128xbf16> to vector<1x8x16xbf16>
    %45 = vector.extract_strided_slice %18 {offsets = [0, 0, 96], sizes = [1, 8, 16], strides = [1, 1, 1]} : vector<1x8x128xbf16> to vector<1x8x16xbf16>
    %46 = vector.extract_strided_slice %18 {offsets = [0, 0, 112], sizes = [1, 8, 16], strides = [1, 1, 1]} : vector<1x8x128xbf16> to vector<1x8x16xbf16>
    %47 = vector.shape_cast %39 : vector<1x8x16xbf16> to vector<1x1x8x16xbf16>
    %48 = vector.shape_cast %40 : vector<1x8x16xbf16> to vector<1x1x8x16xbf16>
    %49 = vector.shape_cast %41 : vector<1x8x16xbf16> to vector<1x1x8x16xbf16>
    %50 = vector.shape_cast %42 : vector<1x8x16xbf16> to vector<1x1x8x16xbf16>
    %51 = vector.shape_cast %43 : vector<1x8x16xbf16> to vector<1x1x8x16xbf16>
    %52 = vector.shape_cast %44 : vector<1x8x16xbf16> to vector<1x1x8x16xbf16>
    %53 = vector.shape_cast %45 : vector<1x8x16xbf16> to vector<1x1x8x16xbf16>
    %54 = vector.shape_cast %46 : vector<1x8x16xbf16> to vector<1x1x8x16xbf16>
    %55 = tpu.concatenate %47, %48, %49, %50, %51, %52, %53, %54 in 0 : vector<1x1x8x16xbf16>, vector<1x1x8x16xbf16>, vector<1x1x8x16xbf16>, vector<1x1x8x16xbf16>, vector<1x1x8x16xbf16>, vector<1x1x8x16xbf16>, vector<1x1x8x16xbf16>, vector<1x1x8x16xbf16> -> vector<8x1x8x16xbf16>
    %56 = vector.shape_cast %55 : vector<8x1x8x16xbf16> to vector<8x8x16xbf16>
    %57 = vector.extract_strided_slice %20 {offsets = [0, 0, 0], sizes = [1, 8, 16], strides = [1, 1, 1]} : vector<1x8x128xbf16> to vector<1x8x16xbf16>
    %58 = vector.extract_strided_slice %20 {offsets = [0, 0, 16], sizes = [1, 8, 16], strides = [1, 1, 1]} : vector<1x8x128xbf16> to vector<1x8x16xbf16>
    %59 = vector.extract_strided_slice %20 {offsets = [0, 0, 32], sizes = [1, 8, 16], strides = [1, 1, 1]} : vector<1x8x128xbf16> to vector<1x8x16xbf16>
    %60 = vector.extract_strided_slice %20 {offsets = [0, 0, 48], sizes = [1, 8, 16], strides = [1, 1, 1]} : vector<1x8x128xbf16> to vector<1x8x16xbf16>
    %61 = vector.extract_strided_slice %20 {offsets = [0, 0, 64], sizes = [1, 8, 16], strides = [1, 1, 1]} : vector<1x8x128xbf16> to vector<1x8x16xbf16>
    %62 = vector.extract_strided_slice %20 {offsets = [0, 0, 80], sizes = [1, 8, 16], strides = [1, 1, 1]} : vector<1x8x128xbf16> to vector<1x8x16xbf16>
    %63 = vector.extract_strided_slice %20 {offsets = [0, 0, 96], sizes = [1, 8, 16], strides = [1, 1, 1]} : vector<1x8x128xbf16> to vector<1x8x16xbf16>
    %64 = vector.extract_strided_slice %20 {offsets = [0, 0, 112], sizes = [1, 8, 16], strides = [1, 1, 1]} : vector<1x8x128xbf16> to vector<1x8x16xbf16>
    %65 = vector.shape_cast %57 : vector<1x8x16xbf16> to vector<1x1x8x16xbf16>
    %66 = vector.shape_cast %58 : vector<1x8x16xbf16> to vector<1x1x8x16xbf16>
    %67 = vector.shape_cast %59 : vector<1x8x16xbf16> to vector<1x1x8x16xbf16>
    %68 = vector.shape_cast %60 : vector<1x8x16xbf16> to vector<1x1x8x16xbf16>
    %69 = vector.shape_cast %61 : vector<1x8x16xbf16> to vector<1x1x8x16xbf16>
    %70 = vector.shape_cast %62 : vector<1x8x16xbf16> to vector<1x1x8x16xbf16>
    %71 = vector.shape_cast %63 : vector<1x8x16xbf16> to vector<1x1x8x16xbf16>
    %72 = vector.shape_cast %64 : vector<1x8x16xbf16> to vector<1x1x8x16xbf16>
    %73 = tpu.concatenate %65, %66, %67, %68, %69, %70, %71, %72 in 0 : vector<1x1x8x16xbf16>, vector<1x1x8x16xbf16>, vector<1x1x8x16xbf16>, vector<1x1x8x16xbf16>, vector<1x1x8x16xbf16>, vector<1x1x8x16xbf16>, vector<1x1x8x16xbf16>, vector<1x1x8x16xbf16> -> vector<8x1x8x16xbf16>
    %74 = vector.shape_cast %73 : vector<8x1x8x16xbf16> to vector<8x8x16xbf16>
    "tpu.trace_start"() <{level = 10 : i32, message = "bnd,bmd->bnm"}> : () -> ()
    %cst_8 = arith.constant dense<0.000000e+00> : vector<8x8x8xf32>
    %75 = tpu.matmul %38, %56, %cst_8 {dimension_numbers = #tpu.dot_dimension_numbers<[2], [2], [1], [1], [0, 0, 0, 1, 1, 1], [0], [0]>} : vector<8x8x16xbf16>, vector<8x8x16xbf16>, vector<8x8x8xf32> -> vector<8x8x8xf32>
    "tpu.trace_stop"() : () -> ()
    %cst_9 = arith.constant 0.288675129 : f32
    %76 = vector.broadcast %cst_9 : f32 to vector<8x8x8xf32>
    %77 = arith.mulf %76, %75 : vector<8x8x8xf32>
    %cst_10 = arith.constant dense<0xFF800000> : vector<8x8xf32>
    %78 = vector.multi_reduction <maximumf>, %77, %cst_10 [2] : vector<8x8x8xf32> to vector<8x8xf32>
    %79 = vector.shape_cast %78 : vector<8x8xf32> to vector<8x8x1xf32>
    %80 = vector.broadcast %79 : vector<8x8x1xf32> to vector<8x8x8xf32>
    %81 = arith.subf %77, %80 : vector<8x8x8xf32>
    %82 = math.exp %81 : vector<8x8x8xf32>
    %cst_11 = arith.constant dense<0.000000e+00> : vector<8x8xf32>
    %83 = vector.multi_reduction <add>, %82, %cst_11 [2] : vector<8x8x8xf32> to vector<8x8xf32>
    %84 = vector.shape_cast %83 : vector<8x8xf32> to vector<8x8x1xf32>
    %85 = tpu.reciprocal %84 : vector<8x8x1xf32> -> vector<8x8x1xf32>
    %86 = vector.broadcast %85 : vector<8x8x1xf32> to vector<8x8x8xf32>
    %87 = arith.mulf %82, %86 : vector<8x8x8xf32>
    %88 = arith.truncf %87 : vector<8x8x8xf32> to vector<8x8x8xbf16>
    "tpu.trace_start"() <{level = 10 : i32, message = "bnm,bmd->bnd"}> : () -> ()
    %cst_12 = arith.constant dense<0.000000e+00> : vector<8x8x16xf32>
    %89 = tpu.matmul %88, %74, %cst_12 {dimension_numbers = #tpu.dot_dimension_numbers<[2], [1], [1], [2], [0, 0, 0, 1, 1, 2], [0], [0]>} : vector<8x8x8xbf16>, vector<8x8x16xbf16>, vector<8x8x16xf32> -> vector<8x8x16xf32>
    "tpu.trace_stop"() : () -> ()
    %90 = vector.shape_cast %89 : vector<8x8x16xf32> to vector<8x1x8x16xf32>
    %91 = vector.extract_strided_slice %90 {offsets = [0, 0, 0, 0], sizes = [1, 1, 8, 16], strides = [1, 1, 1, 1]} : vector<8x1x8x16xf32> to vector<1x1x8x16xf32>
    %92 = vector.shape_cast %91 : vector<1x1x8x16xf32> to vector<1x8x16xf32>
    %93 = vector.extract_strided_slice %90 {offsets = [1, 0, 0, 0], sizes = [1, 1, 8, 16], strides = [1, 1, 1, 1]} : vector<8x1x8x16xf32> to vector<1x1x8x16xf32>
    %94 = vector.shape_cast %93 : vector<1x1x8x16xf32> to vector<1x8x16xf32>
    %95 = vector.extract_strided_slice %90 {offsets = [2, 0, 0, 0], sizes = [1, 1, 8, 16], strides = [1, 1, 1, 1]} : vector<8x1x8x16xf32> to vector<1x1x8x16xf32>
    %96 = vector.shape_cast %95 : vector<1x1x8x16xf32> to vector<1x8x16xf32>
    %97 = vector.extract_strided_slice %90 {offsets = [3, 0, 0, 0], sizes = [1, 1, 8, 16], strides = [1, 1, 1, 1]} : vector<8x1x8x16xf32> to vector<1x1x8x16xf32>
    %98 = vector.shape_cast %97 : vector<1x1x8x16xf32> to vector<1x8x16xf32>
    %99 = vector.extract_strided_slice %90 {offsets = [4, 0, 0, 0], sizes = [1, 1, 8, 16], strides = [1, 1, 1, 1]} : vector<8x1x8x16xf32> to vector<1x1x8x16xf32>
    %100 = vector.shape_cast %99 : vector<1x1x8x16xf32> to vector<1x8x16xf32>
    %101 = vector.extract_strided_slice %90 {offsets = [5, 0, 0, 0], sizes = [1, 1, 8, 16], strides = [1, 1, 1, 1]} : vector<8x1x8x16xf32> to vector<1x1x8x16xf32>
    %102 = vector.shape_cast %101 : vector<1x1x8x16xf32> to vector<1x8x16xf32>
    %103 = vector.extract_strided_slice %90 {offsets = [6, 0, 0, 0], sizes = [1, 1, 8, 16], strides = [1, 1, 1, 1]} : vector<8x1x8x16xf32> to vector<1x1x8x16xf32>
    %104 = vector.shape_cast %103 : vector<1x1x8x16xf32> to vector<1x8x16xf32>
    %105 = vector.extract_strided_slice %90 {offsets = [7, 0, 0, 0], sizes = [1, 1, 8, 16], strides = [1, 1, 1, 1]} : vector<8x1x8x16xf32> to vector<1x1x8x16xf32>
    %106 = vector.shape_cast %105 : vector<1x1x8x16xf32> to vector<1x8x16xf32>
    %107 = tpu.concatenate %92, %94, %96, %98, %100, %102, %104, %106 in 2 : vector<1x8x16xf32>, vector<1x8x16xf32>, vector<1x8x16xf32>, vector<1x8x16xf32>, vector<1x8x16xf32>, vector<1x8x16xf32>, vector<1x8x16xf32>, vector<1x8x16xf32> -> vector<1x8x128xf32>
    %108 = vector.shape_cast %107 : vector<1x8x128xf32> to vector<8x128xf32>
    %109 = arith.truncf %108 : vector<8x128xf32> to vector<8x128xbf16>
    %c0_13 = arith.constant 0 : index
    %c0_14 = arith.constant 0 : index
    %110 = vector.load %arg5[%c0_13, %c0_14] : memref<128x128xbf16, #tpu.memory_space<vmem>>, vector<128x128xbf16>
    %cst_15 = arith.constant dense<0.000000e+00> : vector<8x128xf32>
    %111 = tpu.matmul %109, %110, %cst_15 {dimension_numbers = #tpu.dot_dimension_numbers<[1], [0], [0], [1], [0, 0, 1, 1], [], []>} : vector<8x128xbf16>, vector<128x128xbf16>, vector<8x128xf32> -> vector<8x128xf32>
    %112 = vector.shape_cast %111 : vector<8x128xf32> to vector<1x8x128xf32>
    %113 = arith.addf %9, %112 : vector<1x8x128xf32>
    %cst_16 = arith.constant 0.000000e+00 : f32
    %114 = vector.broadcast %cst_16 : f32 to vector<1x8x128xf32>
    %115 = arith.maximumf %113, %114 : vector<1x8x128xf32>
    %116 = arith.truncf %115 : vector<1x8x128xf32> to vector<1x8x128xbf16>
    %c0_17 = arith.constant 0 : index
    %c0_18 = arith.constant 0 : index
    %c0_19 = arith.constant 0 : index
    %117 = vector.load %arg6[%c0_17, %c0_18, %c0_19] : memref<1x8x128xbf16, #tpu.memory_space<vmem>>, vector<1x8x128xbf16>
    tpu.vector_store %arg6[%c0_17, %c0_18, %c0_19], %116 {strides = array<i32>} : memref<1x8x128xbf16, #tpu.memory_space<vmem>>, vector<1x8x128xbf16>,
    %118 = arith.extf %116 : vector<1x8x128xbf16> to vector<1x8x128xf32>
    %119 = vector.shape_cast %118 : vector<1x8x128xf32> to vector<8x128xf32>
    %cst_20 = arith.constant dense<0.000000e+00> : vector<128xf32>
    %120 = vector.multi_reduction <add>, %119, %cst_20 [0] : vector<8x128xf32> to vector<128xf32>
    %121 = vector.shape_cast %120 : vector<128xf32> to vector<1x1x128xf32>
    %c0_21 = arith.constant 0 : index
    %c0_22 = arith.constant 0 : index
    %c0_23 = arith.constant 0 : index
    %122 = vector.load %arg7[%c0_21, %c0_22, %c0_23] : memref<1x1x128xf32, #tpu.memory_space<vmem>>, vector<1x1x128xf32>
    tpu.vector_store %arg7[%c0_21, %c0_22, %c0_23], %121 {strides = array<i32>} : memref<1x1x128xf32, #tpu.memory_space<vmem>>, vector<1x1x128xf32>,
    %123 = arith.mulf %119, %119 : vector<8x128xf32>
    %cst_24 = arith.constant dense<0.000000e+00> : vector<128xf32>
    %124 = vector.multi_reduction <add>, %123, %cst_24 [0] : vector<8x128xf32> to vector<128xf32>
    %125 = vector.shape_cast %124 : vector<128xf32> to vector<1x1x128xf32>
    %c0_25 = arith.constant 0 : index
    %c0_26 = arith.constant 0 : index
    %c0_27 = arith.constant 0 : index
    %126 = vector.load %arg8[%c0_25, %c0_26, %c0_27] : memref<1x1x128xf32, #tpu.memory_space<vmem>>, vector<1x1x128xf32>
    tpu.vector_store %arg8[%c0_25, %c0_26, %c0_27], %125 {strides = array<i32>} : memref<1x1x128xf32, #tpu.memory_space<vmem>>, vector<1x1x128xf32>,
    return
  }
  func.func @transform_0(%arg0: i32) -> (i32, i32, i32) {
    %c0_i32 = arith.constant 0 : i32
    %c0_i32_0 = arith.constant 0 : i32
    %c0_i32_1 = arith.constant 0 : i32
    return %arg0, %c0_i32, %c0_i32_0 : i32, i32, i32
  }
  func.func @transform_1(%arg0: i32) -> (i32, i32) {
    %c0_i32 = arith.constant 0 : i32
    %c0_i32_0 = arith.constant 0 : i32
    %c0_i32_1 = arith.constant 0 : i32
    return %c0_i32, %c0_i32_0 : i32, i32
  }
  func.func @transform_2(%arg0: i32) -> (i32, i32) {
    %c0_i32 = arith.constant 0 : i32
    %c0_i32_0 = arith.constant 0 : i32
    %c0_i32_1 = arith.constant 0 : i32
    return %c0_i32, %c0_i32_0 : i32, i32
  }
  func.func @transform_3(%arg0: i32) -> (i32, i32) {
    %c0_i32 = arith.constant 0 : i32
    %c0_i32_0 = arith.constant 0 : i32
    %c0_i32_1 = arith.constant 0 : i32
    return %c0_i32, %c0_i32_0 : i32, i32
  }
  func.func @transform_4(%arg0: i32) -> (i32, i32) {
    %c0_i32 = arith.constant 0 : i32
    %c0_i32_0 = arith.constant 0 : i32
    %c0_i32_1 = arith.constant 0 : i32
    return %c0_i32, %c0_i32_0 : i32, i32
  }
  func.func @transform_5(%arg0: i32) -> (i32, i32, i32) {
    %c0_i32 = arith.constant 0 : i32
    %c0_i32_0 = arith.constant 0 : i32
    %c0_i32_1 = arith.constant 0 : i32
    return %arg0, %c0_i32, %c0_i32_0 : i32, i32, i32
  }
  func.func @transform_6(%arg0: i32) -> (i32, i32, i32) {
    %c0_i32 = arith.constant 0 : i32
    %c0_i32_0 = arith.constant 0 : i32
    %c0_i32_1 = arith.constant 0 : i32
    return %arg0, %c0_i32, %c0_i32_0 : i32, i32, i32
  }
  func.func @transform_7(%arg0: i32) -> (i32, i32, i32) {
    %c0_i32 = arith.constant 0 : i32
    %c0_i32_0 = arith.constant 0 : i32
    %c0_i32_1 = arith.constant 0 : i32
    return %arg0, %c0_i32, %c0_i32_0 : i32, i32, i32
  }
}

</mosaic_0001>

<bundles_post_ra>
// kernel: _lambda_.5
= control target key start
LH: loop header
LB: loop body
LE: loop exit
PB: predicated region body
PF: predicated region fallthrough
CT: control target
= control target key end

     0   :  { %s132_s0 = inlined_call_operand.vmem [shape: bf16[16,128], index: 0, kind: input, shape index: {}]   ;;  %s133_s1 = inlined_call_operand.vmem [shape: f32[1,128], index: 1, kind: input, shape index: {}]   ;;  %s134_s2 = inlined_call_operand.vmem [shape: f32[1,128], index: 2, kind: input, shape index: {}]   ;;  %s135_s3 = inlined_call_operand.hbm [shape: f32[16,128], index: 3, kind: output, shape index: {}]  }
   0x1   :  { %v58_v0 = vld [vmem:[%s132_s0] sm:$0xff]  }
   0x2   :  { %v55_v1 = vld [vmem:[%s133_s1] ss:$0 sm:$0xff]  ;;  %v59_v2 = vunpack.c.l.bf16 %v58_v0  ;;  %v60_v3 = vunpack.c.h.bf16 %v58_v0 }
   0x3   :  { %8 = vsyncpa [#allocation3], 0  ;;  %v56_v4 = vld [vmem:[%s134_s2] ss:$0 sm:$0xff]  ;;  %s88_s18 = smov [#allocation2]  }
   0x4   :  { %s44_s19 = sshll.u32 %s88_s18, 4  ;;  %v26_v5 = vmul.f32 %v59_v2, %v55_v1  ;;  %v27_v6 = vmul.f32 %v60_v3, %v55_v1  ;;  %s45_s19 = int_to_ptr.vmem [resolvable:$true] %s44_s19 }
   0x5   :  { %s64_s0 = scalar_lea.vmem %s45_s19, 256  ;;  %p69_p1 = scmp.lt.s32.totalorder %s45_s19, %s45_s19 }
   0x6   :  { %v35_v7 = vadd.f32 %v56_v4, %v26_v5  ;;  %v36_v8 = vadd.f32 %v56_v4, %v27_v6  ;;  %p65_p0 = scmp.ne.s32.totalorder %s45_s19, %s64_s0  ;;  %p70_p2 = scmp.lt.s32.totalorder %s64_s0, %s64_s0 }
   0x8   :  { %37 = vst [vmem:[#allocation2] sm:$0xff] %v35_v7  ;;  %38 = vst [vmem:[#allocation2 + $0x8] sm:$0xff] %v36_v8  ;;  %p71_p3 = por %p70_p2, %p69_p1 }
   0xa   :  { %p72_p4 = pnand %p71_p3, %p65_p0 }
   0xc   :  { %75 = shalt.err (!%p72_p4)
}
   0xd   :  { %s76_s2 = scalar_lea.hbm %s135_s3, 256 }
   0xe   :  { %p77_p5 = scmp.ne.s32.totalorder %s135_s3, %s76_s2  ;;  %p80_p6 = scmp.lt.u32.totalorder %s76_s2, %s135_s3 }
  0x10   :  { %p82_p7 = pnand %p80_p6, %p77_p5 }
  0x12   :  { %85 = shalt.err (!%p82_p7)
}
  0x13   :  { %s89_s25 = smov 128   ;;  %s90_s26 = smov 8  }
  0x14   :  { %50 = dma.vmem_to_hbm [thread:$0]  %s45_s19, 256, %s135_s3, [#allocation3], %s89_s25, %s89_s25, %s90_s26  }
  0x15   :  { %86 = dma.done.wait [#allocation3], 256  }
  0x16   :  { %87 = vsyncadd [#allocation3], 4294967040 }
  0x17   :  { %54 = vsyncpa [#allocation3], 1 }

// kernel: _lambda_.3
= control target key start
LH: loop header
LB: loop body
LE: loop exit
PB: predicated region body
PF: predicated region fallthrough
CT: control target
= control target key end

     0   :  { %s2105_s24 = smov 0   ;;  %s2422_s0 = inlined_call_operand.vmem [shape: bf16[2,8,128], index: 0, kind: input, shape index: {}]   ;;  %s2423_s1 = inlined_call_operand.vmem [shape: f32[1,128], index: 1, kind: input, shape index: {}]   ;;  %s2424_s2 = inlined_call_operand.vmem [shape: f32[1,128], index: 2, kind: input, shape index: {}]   ;;  %s2425_s3 = inlined_call_operand.vmem [shape: bf16[128,384], index: 3, kind: input, shape index: {}]   ;;  %s2426_s4 = inlined_call_operand.vmem [shape: bf16[128,128], index: 4, kind: input, shape index: {}]   ;;  %s2427_s5 = inlined_call_operand.vmem [shape: bf16[2,8,128], index: 5, kind: output, shape index: {0}]   ;;  %s2428_s6 = inlined_call_operand.vmem [shape: f32[2,1,128], index: 6, kind: output, shape index: {1}]   ;;  %s2429_s7 = inlined_call_operand.vmem [shape: f32[2,1,128], index: 7, kind: output, shape index: {2}]  }
   0x1 LB: > { %s1712_s25 = sadd.s32 4294967295, %s2053_s24   ;;  %p1716_p0 = scmp.ge.s32.totalorder %s2053_s24, 1  ;;  %s2053_s24 = sphi %s2105_s24, %s18_s24  }
   0x2   : > { %p241_p1 = scmp.lt.s32.totalorder %s2053_s24, 3 }
   0x4   : > { %p242_p2 = pnand %p1716_p0, %p241_p1 }
   0x5   : > { %v1975_v0 = vld [vmem:[%s2425_s3 + $0x4] ss:$12 sps:$4 sm:$0xff] (!%p242_p2)   ;;  %v1977_v1 = vld [vmem:[%s2425_s3] ss:$12 sps:$4 sm:$0xff] (!%p242_p2)   ;;  %v2055_v2 = vmov (!%p242_p2), 0   ;;  %p277_p3 = scmp.lt.s32.totalorder (!%p242_p2), %s1712_s25, 1 }
   0x6   : > { %245 = sbr.rel (%p242_p2) target bundleno = 1548 (0x60c), region = 40  ;;  %503 = vmatprep.mubr.bf16.mxu0 (!%p242_p2), %v2055_v2  ;;  %471 = vmatprep.subr.bf16.mxu0 (!%p242_p2), %v1975_v0  ;;  %v1978_v3 = vld [vmem:[%s2425_s3 + $0x1c] ss:$12 sps:$4 sm:$0xff] (!%p242_p2)   ;;  %v2056_v4 = vmov (!%p242_p2), 0.0   ;;  %v1980_v5 = vld [vmem:[%s2425_s3 + $0x18] ss:$12 sps:$4 sm:$0xff] (!%p242_p2)  }
   0x7   : > { %1821 = vmatprep.subr.bf16.mxu1 (!%p242_p2), %v2056_v4  ;;  %472 = vmatpush1.bf16.msra.mxu0 (!%p242_p2), %v1977_v1  ;;  %v1981_v6 = vld [vmem:[%s2425_s3 + $0x34] ss:$12 sps:$4 sm:$0xff] (!%p242_p2)   ;;  %v1983_v7 = vld [vmem:[%s2425_s3 + $0x30] ss:$12 sps:$4 sm:$0xff] (!%p242_p2)   ;;  %v1984_v8 = vld [vmem:[%s2425_s3 + $0x4c] ss:$12 sps:$4 sm:$0xff] (!%p242_p2)  }
   0x8   : > { %473 = vmatprep.subr.bf16.mxu0 (!%p242_p2), %v1978_v3  ;;  %v1986_v9 = vld [vmem:[%s2425_s3 + $0x48] ss:$12 sps:$4 sm:$0xff] (!%p242_p2)   ;;  %v1987_v10 = vld [vmem:[%s2425_s3 + $0x64] ss:$12 sps:$4 sm:$0xff] (!%p242_p2)   ;;  %v1989_v12 = vld [vmem:[%s2425_s3 + $0x60] ss:$12 sps:$4 sm:$0xff] (!%p242_p2)  }
   0x9   : > { %v1999_v11 = vld [vmem:[%s2425_s3 + $0x8] ss:$12 sps:$4 sm:$0xff] (!%p242_p2)   ;;  %v2000_v13 = vld [vmem:[%s2425_s3 + $0x20] ss:$12 sps:$4 sm:$0xff] (!%p242_p2)   ;;  %v1992_v16 = vld [vmem:[%s2425_s3 + $0x78] ss:$12 sps:$4 sm:$0xff] (!%p242_p2)  }
   0xa   : > { %1822 = vmatpush3.bf16.msra.mxu1 (!%p242_p2), %v1999_v11  ;;  %v1990_v15 = vld [vmem:[%s2425_s3 + $0x7c] ss:$12 sps:$4 sm:$0xff] (!%p242_p2)   ;;  %v1993_v17 = vld [vmem:[%s2425_s3 + $0x94] ss:$12 sps:$4 sm:$0xff] (!%p242_p2)   ;;  %v2001_v19 = vld [vmem:[%s2425_s3 + $0x38] ss:$12 sps:$4 sm:$0xff] (!%p242_p2)  }
   0xb   : > { %474 = vmatpush1.bf16.msra.mxu0 (!%p242_p2), %v1980_v5  ;;  %1823 = vmatprep.subr.bf16.mxu1 (!%p242_p2), %v2056_v4  ;;  %v1719_v20 = vld [vmem:[%s2423_s1] ss:$0 sm:$0xff] (!%p242_p2)  ;;  %v2002_v21 = vld [vmem:[%s2425_s3 + $0x50] ss:$12 sps:$4 sm:$0xff] (!%p242_p2)   ;;  %v1996_v24 = vld [vmem:[%s2425_s3 + $0xac] ss:$12 sps:$4 sm:$0xff] (!%p242_p2)  }
   0xc   : > { %475 = vmatprep.subr.bf16.mxu0 (!%p242_p2), %v1981_v6  ;;  %v1995_v22 = vld [vmem:[%s2425_s3 + $0x90] ss:$12 sps:$4 sm:$0xff] (!%p242_p2)   ;;  %v1720_v23 = vld [vmem:[%s2424_s2] ss:$0 sm:$0xff] (!%p242_p2)  ;;  %v2003_v27 = vld [vmem:[%s2425_s3 + $0x68] ss:$12 sps:$4 sm:$0xff] (!%p242_p2)  }
   0xd   : > { %s2431_s25 = smov (!%p277_p3, %s1712_s25), 1  ;;  %v1998_v28 = vld [vmem:[%s2425_s3 + $0xa8] ss:$12 sps:$4 sm:$0xff]   ;;  %v2004_v30 = vld [vmem:[%s2425_s3 + $0x80] ss:$12 sps:$4 sm:$0xff]   ;;  %vm2057_vm0 = vmmov 0  }
   0xe   : > { %s1717_s17 = sshll.u32 %s2431_s25, 2  ;;  %1824 = vmatpush3.bf16.msra.mxu1 %v2000_v13  ;;  %v2005_v31 = vld [vmem:[%s2425_s3 + $0x98] ss:$12 sps:$4 sm:$0xff]   ;;  %v2006_v32 = vld [vmem:[%s2425_s3 + $0xb0] ss:$12 sps:$4 sm:$0xff]   ;;  %1837 = vmatprep.mubr.msk.bf16.mxu1 %vm2057_vm0, %v2056_v4  ;;  %vm600_vm1 = vcmask 130048   ;;  %s287_s29 = scalar_lea.vmem %s2428_s6, %s2431_s25 }
   0xf   : > { %476 = vmatpush1.bf16.msra.mxu0 %v1983_v7  ;;  %s280_s26 = scalar_lea.vmem %s2422_s0, %s1717_s17  ;;  %1825 = vmatprep.subr.bf16.mxu1 %v2056_v4  ;;  %s2058_s19 = smov 96   ;;  %vm1077_vm2 = vcmask 1043456   ;;  %vm977_vm3 = vcmask 64512   ;;  %vm1472_vm4 = vcmask 261120   ;;  %vm1474_vm5 = vcmask 392192  }
  0x10   : > { %477 = vmatprep.subr.bf16.mxu0 %v1984_v8  ;;  %v292_v14 = vld [vmem:[%s280_s26] sm:$0xf]  ;;  %s2059_s20 = smov 112   ;;  %s2060_s21 = smov 64   ;;  %vm1476_vm6 = vcmask 523264   ;;  %vm1478_vm7 = vcmask 654336  }
  0x11   : > { %v293_v18 = vunpack.c.l.bf16 %v292_v14  ;;  %s2061_s22 = smov 80   ;;  %s2062_s23 = smov 48   ;;  %vm1480_vm8 = vcmask 785408   ;;  %vm1482_vm9 = vcmask 916480  }
  0x12   : > { %1826 = vmatpush3.bf16.msra.mxu1 %v2001_v19  ;;  %s2063_s26 = smov 32   ;;  %s2064_s27 = smov 16  }
  0x13   : > { %478 = vmatpush1.bf16.msra.mxu0 %v1986_v9  ;;  %v301_v25 = vmul.f32 %v1719_v20, %v293_v18  ;;  %1827 = vmatprep.subr.bf16.mxu1 %v2056_v4  ;;  %s290_s8 = scalar_lea.vmem %s2429_s7, %s2431_s25 }
  0x14   : > { %479 = vmatprep.subr.bf16.mxu0 %v1987_v10 }
  0x15   : > { %v2188_v26 = vadd.f32 %v1720_v23, %v301_v25 }
  0x16   : > { %1828 = vmatpush3.bf16.msra.mxu1 %v2002_v21 }
  0x17   : > { %480 = vmatpush1.bf16.msra.mxu0 %v1989_v12  ;;  %1829 = vmatprep.subr.bf16.mxu1 %v2056_v4  ;;  %v310_v29 = vpack.c.bf16 %v2188_v26, %v2188_v26 }
  0x18   : > { %481 = vmatprep.subr.bf16.mxu0 %v1990_v15 }
  0x1a   : > { %1830 = vmatpush3.bf16.msra.mxu1 %v2003_v27 }
  0x1b   : > { %482 = vmatpush1.bf16.msra.mxu0 %v1992_v16  ;;  %1831 = vmatprep.subr.bf16.mxu1 %v2056_v4 }
  0x1c   : > { %483 = vmatprep.subr.bf16.mxu0 %v1993_v17 }
  0x1e   : > { %1832 = vmatpush3.bf16.msra.mxu1 %v2004_v30 }
  0x1f   : > { %484 = vmatpush1.bf16.msra.mxu0 %v1995_v22  ;;  %1833 = vmatprep.subr.bf16.mxu1 %v2056_v4 }
  0x20   : > { %485 = vmatprep.subr.bf16.mxu0 %v1996_v24 }
  0x22   : > { %1834 = vmatpush3.bf16.msra.mxu1 %v2005_v31 }
  0x23   : > { %486 = vmatpush1.bf16.msra.mxu0 %v1998_v28  ;;  %1835 = vmatprep.subr.bf16.mxu1 %v2056_v4 }
  0x24   : > { %1865 = vmatprep.subr.bf16.mxu0 %v2056_v4 }
  0x26   : > { %504 = vmatmul.mubr.bf16.vlgmr.msra.gmra.mrb[0].mxu0 %v310_v29  ;;  %1836 = vmatpush3.bf16.msra.mxu1 %v2006_v32 }
  0x27   : > { %1841 = vmatprep.subr.bf16.mxu1 %v2056_v4  ;;  %1867 = vmatprep.mubr.msk.bf16.mxu0 %vm2057_vm0, %v2056_v4 }
  0x29   : > { %1838 = vmatmul.mubr.bf16.vlgmr.msra.gmra.mrb[0].mxu1 %v310_v29 }
  0x2a   : > { %1843 = vmatprep.mubr.msk.bf16.mxu1 %vm2057_vm0, %v2056_v4 }
  0xf9   : > { %v505_v33 = vpop.f32.mrb[0].mxu0 }
  0xfa   : > { %v507_v34 = vpop.f32.mrb[1].mxu0  ;;  %v552_v39 = vpack.c.bf16 %v505_v33, %v505_v33 }
  0xfb   : > { %v553_v35 = vpack.c.bf16 %v507_v34, %v507_v34  ;;  %v509_v36 = vpop.f32.mrb[2].mxu0 }
  0xfc   : > { %v510_v37 = vpop.f32.mrb[3].mxu0  ;;  %v546_v40 = vpop.f32.mrb[0].mxu1 }
  0xfd   : > { %573 = vrot.lane.b32.xlu1 %v553_v35, %s2058_s19  ;;  %571 = vrot.lane.b32.xlu0 %v553_v35, %s2059_s20  ;;  %v605_v38 = vsel %vm600_vm1, %v553_v35, 0  ;;  %v2238_v41 = vpack.c.bf16 %v546_v40, %v546_v40  ;;  %v1839_v42 = vpop.f32.mrb[1].mxu1 }
  0xfe   : > { %1842 = vmatpush3.bf16.xpose.msra.mxu1 %v605_v38  ;;  %v549_v43 = vpop.f32.mrb[2].mxu1 }
  0xff   : > { %1847 = vmatprep.subr.bf16.mxu1 %v2056_v4  ;;  %v1840_v44 = vpop.f32.mrb[3].mxu1  ;;  %v1079_v62 = vsel %vm1077_vm2, %v2238_v41, 0 }
 0x101   : > { %558 = vrot.lane.b32.xlu1 %v552_v39, %s2058_s19  ;;  %556 = vrot.lane.b32.xlu0 %v552_v39, %s2059_s20 }
 0x105   : > { %577 = vrot.lane.b32.xlu1 %v553_v35, %s2060_s21  ;;  %575 = vrot.lane.b32.xlu0 %v553_v35, %s2061_s22 }
 0x106   : > { %1844 = vmatmul.mubr.msk.bf16.vlgmr.msra.gmra.mrb[4].mxu1 %vm600_vm1, %v552_v39 }
 0x107   : > { %1849 = vmatprep.mubr.msk.bf16.mxu1 %vm2057_vm0, %v2056_v4 }
 0x109   : > { %579 = vrot.lane.b32.xlu1 %v553_v35, %s2062_s23  ;;  %560 = vrot.lane.b32.xlu0 %v552_v39, %s2061_s22 }
 0x10d   : > { %581 = vrot.lane.b32.xlu1 %v553_v35, %s2063_s26  ;;  %562 = vrot.lane.b32.xlu0 %v552_v39, %s2060_s21 }
 0x111   : > { %583 = vrot.lane.b32.xlu1 %v553_v35, %s2064_s27  ;;  %564 = vrot.lane.b32.xlu0 %v552_v39, %s2062_s23 }
 0x115   : > { %568 = vrot.lane.b32.xlu1 %v552_v39, %s2064_s27  ;;  %566 = vrot.lane.b32.xlu0 %v552_v39, %s2063_s26 }
 0x119   : > { %586 = vrot.lane.b32.xlu1 %v2238_v41, %s2059_s20 }
 0x16f   : > { %v574_v45 = vpop.permute.xlu1 %573  ;;  %v572_v46 = vpop.permute.xlu0 %571 }
 0x170   : > { %v651_v47 = vsel %vm600_vm1, %v572_v46, 0  ;;  %v697_v52 = vsel %vm600_vm1, %v574_v45, 0 }
 0x171   : > { %1848 = vmatpush3.bf16.xpose.msra.mxu1 %v651_v47 }
 0x172   : > { %1853 = vmatprep.subr.bf16.mxu1 %v2056_v4 }
 0x173   : > { %v559_v48 = vpop.permute.xlu1 %558  ;;  %v557_v49 = vpop.permute.xlu0 %556 }
 0x177   : > { %v578_v50 = vpop.permute.xlu1 %577  ;;  %v576_v51 = vpop.permute.xlu0 %575 }
 0x178   : > { %v789_v53 = vsel %vm600_vm1, %v578_v50, 0  ;;  %1850 = vmatmul.mubr.msk.bf16.vlgmr.msra.gmra.mrb[8].mxu1 %vm600_vm1, %v557_v49  ;;  %v743_v58 = vsel %vm600_vm1, %v576_v51, 0 }
 0x179   : > { %1854 = vmatpush3.bf16.xpose.msra.mxu1 %v697_v52  ;;  %1866 = vmatpush3.bf16.xpose.msra.mxu0 %v789_v53 }
 0x17a   : > { %1855 = vmatprep.mubr.msk.bf16.mxu1 %vm2057_vm0, %v2056_v4  ;;  %1859 = vmatprep.subr.bf16.mxu1 %v2056_v4 }
 0x17b   : > { %v580_v54 = vpop.permute.xlu1 %579  ;;  %v561_v55 = vpop.permute.xlu0 %560  ;;  %1877 = vmatprep.subr.bf16.mxu0 %v2056_v4 }
 0x17c   : > { %v835_v63 = vsel %vm600_vm1, %v580_v54, 0 }
 0x17f   : > { %v582_v56 = vpop.permute.xlu1 %581  ;;  %v563_v57 = vpop.permute.xlu0 %562 }
 0x180   : > { %v881_v59 = vsel %vm600_vm1, %v582_v56, 0  ;;  %1856 = vmatmul.mubr.msk.bf16.vlgmr.msra.gmra.mrb[12].mxu1 %vm600_vm1, %v559_v48  ;;  %1868 = vmatmul.mubr.msk.bf16.vlgmr.msra.gmra.mrb[4].mxu0 %vm600_vm1, %v563_v57 }
 0x181   : > { %1860 = vmatpush3.bf16.xpose.msra.mxu1 %v743_v58  ;;  %1878 = vmatpush3.bf16.xpose.msra.mxu0 %v881_v59 }
 0x182   : > { %1879 = vmatprep.mubr.msk.bf16.mxu0 %vm2057_vm0, %v2056_v4  ;;  %1861 = vmatprep.mubr.msk.bf16.mxu1 %vm2057_vm0, %v2056_v4 }
 0x183   : > { %v565_v60 = vpop.permute.xlu0 %564  ;;  %1871 = vmatprep.subr.bf16.mxu1 %v2056_v4  ;;  %1889 = vmatprep.subr.bf16.mxu0 %v2056_v4  ;;  %v584_v0 = vpop.permute.xlu1 %583 }
 0x184   : > { %v927_v1 = vsel %vm600_vm1, %v584_v0, 0 }
 0x187   : > { %v567_v61 = vpop.permute.xlu0 %566  ;;  %v569_v2 = vpop.permute.xlu1 %568 }
 0x188   : > { %1862 = vmatmul.mubr.msk.bf16.vlgmr.msra.gmra.mrb[16].mxu1 %vm600_vm1, %v561_v55  ;;  %1880 = vmatmul.mubr.msk.bf16.vlgmr.msra.gmra.mrb[8].mxu0 %vm600_vm1, %v567_v61 }
 0x189   : > { %1872 = vmatpush3.bf16.xpose.msra.mxu1 %v835_v63  ;;  %1873 = vmatprep.mubr.msk.bf16.mxu1 %vm2057_vm0, %v2056_v4 }
 0x18a   : > { %1883 = vmatprep.subr.bf16.mxu1 %v2056_v4  ;;  %1890 = vmatpush3.bf16.msra.mxu0 %v1079_v62 }
 0x18b   : > { %1891 = vmatprep.mubr.msk.bf16.mxu0 %vm2057_vm0, %v2056_v4  ;;  %1901 = vmatprep.subr.bf16.mxu0 %v2056_v4  ;;  %v587_v10 = vpop.permute.xlu1 %586 }
 0x18c   : > { %v1125_v11 = vsel %vm1077_vm2, %v587_v10, 0 }
 0x190   : > { %1874 = vmatmul.mubr.msk.bf16.vlgmr.msra.gmra.mrb[20].mxu1 %vm600_vm1, %v565_v60 }
 0x191   : > { %1884 = vmatpush3.bf16.xpose.msra.mxu1 %v927_v1  ;;  %1885 = vmatprep.mubr.msk.bf16.mxu1 %vm2057_vm0, %v2056_v4 }
 0x192   : > { %1895 = vmatprep.subr.bf16.mxu1 %v2056_v4 }
 0x198   : > { %1886 = vmatmul.mubr.msk.bf16.vlgmr.msra.gmra.mrb[24].mxu1 %vm600_vm1, %v569_v2 }
 0x199   : > { %1897 = vmatprep.mubr.msk.bf16.mxu1 %vm2057_vm0, %v2056_v4  ;;  %1896 = vmatpush3.bf16.msra.mxu1 %v1125_v11 }
 0x19a   : > { %1907 = vmatprep.subr.bf16.mxu1 %v2056_v4 }
 0x1d9   : > { %v641_v3 = vpop.f32.mrb[4].mxu1 }
 0x1da   : > { %v969_v5 = vmul.f32 0.28867513, %v641_v3  ;;  %v1845_v6 = vpop.f32.mrb[5].mxu1 }
 0x1db   : > { %v644_v7 = vpop.f32.mrb[6].mxu1 }
 0x1dc   : > { %v1846_v8 = vpop.f32.mrb[7].mxu1  ;;  %v978_v9 = vsel %vm977_vm3, %v969_v5, -inf }
 0x1dd   : > { %979 = vmax.xlane.f32.xlu0 %v978_v9 }
 0x24b   : > { %v687_v12 = vpop.f32.mrb[8].mxu1 }
 0x24c   : > { %v970_v13 = vmul.f32 0.28867513, %v687_v12  ;;  %v1851_v14 = vpop.f32.mrb[9].mxu1 }
 0x24d   : > { %v690_v15 = vpop.f32.mrb[10].mxu1 }
 0x24e   : > { %v1852_v16 = vpop.f32.mrb[11].mxu1  ;;  %v981_v17 = vsel %vm977_vm3, %v970_v13, -inf }
 0x24f   : > { %982 = vmax.xlane.f32.xlu1 %v981_v17 }
 0x253   : > { %v733_v18 = vpop.f32.mrb[12].mxu1  ;;  %v825_v19 = vpop.f32.mrb[4].mxu0 }
 0x254   : > { %v971_v20 = vmul.f32 0.28867513, %v733_v18  ;;  %v973_v21 = vmul.f32 0.28867513, %v825_v19  ;;  %v1857_v22 = vpop.f32.mrb[13].mxu1  ;;  %v1869_v23 = vpop.f32.mrb[5].mxu0 }
 0x255   : > { %v736_v24 = vpop.f32.mrb[14].mxu1  ;;  %v828_v25 = vpop.f32.mrb[6].mxu0 }
 0x256   : > { %v1858_v27 = vpop.f32.mrb[15].mxu1  ;;  %v1870_v28 = vpop.f32.mrb[7].mxu0  ;;  %v984_v29 = vsel %vm977_vm3, %v971_v20, -inf  ;;  %v990_v30 = vsel %vm977_vm3, %v973_v21, -inf }
 0x257   : > { %985 = vmax.xlane.f32.xlu0 %v984_v29  ;;  %991 = vmax.xlane.f32.xlu1 %v990_v30 }
 0x25b   : > { %v779_v31 = vpop.f32.mrb[16].mxu1  ;;  %v917_v32 = vpop.f32.mrb[8].mxu0 }
 0x25c   : > { %v972_v33 = vmul.f32 0.28867513, %v779_v31  ;;  %v2286_v34 = vmul.f32 0.28867513, %v917_v32  ;;  %v1863_v35 = vpop.f32.mrb[17].mxu1  ;;  %v1881_v36 = vpop.f32.mrb[9].mxu0 }
 0x25d   : > { %v782_v37 = vpop.f32.mrb[18].mxu1  ;;  %v920_v38 = vpop.f32.mrb[10].mxu0 }
 0x25e   : > { %v1864_v39 = vpop.f32.mrb[19].mxu1  ;;  %v1882_v40 = vpop.f32.mrb[11].mxu0  ;;  %v987_v42 = vsel %vm977_vm3, %v972_v33, -inf  ;;  %v996_v43 = vsel %vm977_vm3, %v2286_v34, -inf }
 0x25f   : > { %988 = vmax.xlane.f32.xlu0 %v987_v42  ;;  %997 = vmax.xlane.f32.xlu1 %v996_v43 }
 0x263   : > { %v871_v44 = vpop.f32.mrb[20].mxu1 }
 0x264   : > { %v974_v45 = vmul.f32 0.28867513, %v871_v44  ;;  %v1875_v46 = vpop.f32.mrb[21].mxu1 }
 0x265   : > { %v874_v47 = vpop.f32.mrb[22].mxu1 }
 0x266   : > { %v1876_v48 = vpop.f32.mrb[23].mxu1  ;;  %v993_v49 = vsel %vm977_vm3, %v974_v45, -inf }
 0x267   : > { %994 = vmax.xlane.f32.xlu0 %v993_v49 }
 0x26a   : > { %v980_v56 = vpop.xlane.xlu0 %979 }
 0x26b   : > { %v963_v50 = vpop.f32.mrb[24].mxu1  ;;  %v1002_v57 = vsub.f32 %v969_v5, %v980_v56 }
 0x26c   : > { %v976_v51 = vmul.f32 0.28867513, %v963_v50  ;;  %v1887_v52 = vpop.f32.mrb[25].mxu1 }
 0x26d   : > { %v966_v53 = vpop.f32.mrb[26].mxu1  ;;  %v1010_v58 = vmul.f32 1.442695, %v1002_v57 }
 0x26e   : > { %v1888_v54 = vpop.f32.mrb[27].mxu1  ;;  %v999_v55 = vsel %vm977_vm3, %v976_v51, -inf }
 0x26f   : > { %1000 = vmax.xlane.f32.xlu0 %v999_v55  ;;  %2015 = vpow2.f32 %v1010_v58 }
 0x270   : > { %590 = vrot.lane.b32.xlu1 %v2238_v41, %s2061_s22 }
 0x279   : > { %v2016_v59 = vpop.eup %2015 }
 0x27a   : > { %v1026_v60 = vsel %vm977_vm3, %v2016_v59, 0.0 }
 0x285   : > { %588 = vrot.lane.b32.xlu0 %v2238_v41, %s2058_s19 }
 0x294   : > { %1027 = vadd.xlane.f32.xlu1 %v1026_v60 }
 0x2dc   : > { %v983_v61 = vpop.xlane.xlu1 %982 }
 0x2dd   : > { %v1003_v62 = vsub.f32 %v970_v13, %v983_v61 }
 0x2df   : > { %v1012_v63 = vmul.f32 1.442695, %v1003_v62 }
 0x2e1   : > { %2017 = vpow2.f32 %v1012_v63 }
 0x2e4   : > { %v986_v0 = vpop.xlane.xlu0 %985  ;;  %v992_v1 = vpop.xlane.xlu1 %991 }
 0x2e5   : > { %v1004_v2 = vsub.f32 %v971_v20, %v986_v0  ;;  %v1006_v3 = vsub.f32 %v973_v21, %v992_v1 }
 0x2e7   : > { %v1018_v6 = vmul.f32 1.442695, %v1006_v3  ;;  %v1014_v7 = vmul.f32 1.442695, %v1004_v2 }
 0x2e9   : > { %2019 = vpow2.f32 %v1018_v6 }
 0x2ea   : > { %2021 = vpow2.f32 %v1014_v7 }
 0x2eb   : > { %v2018_v5 = vpop.eup %2017 }
 0x2ec   : > { %v989_v8 = vpop.xlane.xlu0 %988  ;;  %v1029_v9 = vsel %vm977_vm3, %v2018_v5, 0.0  ;;  %v998_v18 = vpop.xlane.xlu1 %997 }
 0x2ed   : > { %v1005_v10 = vsub.f32 %v972_v33, %v989_v8  ;;  %1030 = vadd.xlane.f32.xlu0 %v1029_v9  ;;  %v1008_v19 = vsub.f32 %v2286_v34, %v998_v18 }
 0x2ef   : > { %v1016_v11 = vmul.f32 1.442695, %v1005_v10  ;;  %v1022_v22 = vmul.f32 1.442695, %v1008_v19 }
 0x2f0   : > { %v591_v23 = vpop.permute.xlu1 %590 }
 0x2f1   : > { %2023 = vpow2.f32 %v1016_v11  ;;  %v1217_v48 = vsel %vm1077_vm2, %v591_v23, 0  ;;  %v2007_v23 = vld [vmem:[%s2426_s4] sm:$0xff]  }
 0x2f2   : > { %2025 = vpow2.f32 %v1022_v22 }
 0x2f3   : > { %v2299_v12 = vpop.eup %2019 }
 0x2f4   : > { %v1038_v13 = vsel %vm977_vm3, %v2299_v12, 0.0  ;;  %v2022_v14 = vpop.eup %2021  ;;  %v995_v20 = vpop.xlane.xlu0 %994 }
 0x2f5   : > { %1039 = vadd.xlane.f32.xlu1 %v1038_v13  ;;  %v1032_v15 = vsel %vm977_vm3, %v2022_v14, 0.0  ;;  %v1007_v21 = vsub.f32 %v974_v45, %v995_v20 }
 0x2f7   : > { %v1020_v25 = vmul.f32 1.442695, %v1007_v21 }
 0x2f9   : > { %1033 = vadd.xlane.f32.xlu1 %v1032_v15 }
 0x2fb   : > { %v2024_v16 = vpop.eup %2023 }
 0x2fc   : > { %v1035_v17 = vsel %vm977_vm3, %v2024_v16, 0.0  ;;  %v1001_v24 = vpop.xlane.xlu0 %1000  ;;  %v2310_v30 = vpop.eup %2025 }
 0x2fd   : > { %1036 = vadd.xlane.f32.xlu0 %v1035_v17  ;;  %v1009_v27 = vsub.f32 %v976_v51, %v1001_v24  ;;  %v1044_v35 = vsel %vm977_vm3, %v2310_v30, 0.0  ;;  %v2008_v24 = vld [vmem:[%s2426_s4 + $0x8] sm:$0xff]  }
 0x2ff   : > { %v1024_v29 = vmul.f32 1.442695, %v1009_v27 }
 0x300   : > { %v589_v34 = vpop.permute.xlu0 %588 }
 0x301   : > { %v1171_v37 = vsel %vm1077_vm2, %v589_v34, 0 }
 0x30a   : > { %592 = vrot.lane.b32.xlu1 %v2238_v41, %s2060_s21 }
 0x313   : > { %594 = vrot.lane.b32.xlu0 %v2238_v41, %s2062_s23 }
 0x321   : > { %v1028_v28 = vpop.xlane.xlu1 %1027 }
 0x322   : > { %2027 = vrcp.f32 %v1028_v28 }
 0x323   : > { %2029 = vpow2.f32 %v1020_v25 }
 0x324   : > { %2031 = vpow2.f32 %v1024_v29  ;;  %v2009_v29 = vld [vmem:[%s2426_s4 + $0x10] sm:$0xff]  }
 0x32c   : > { %v2028_v31 = vpop.eup %2027 }
 0x32d   : > { %v1058_v32 = vmul.f32 %v2028_v31, %v2016_v59  ;;  %v2312_v33 = vpop.eup %2029 }
 0x32e   : > { %1045 = vadd.xlane.f32.xlu1 %v1044_v35  ;;  %v1041_v38 = vsel %vm977_vm3, %v2312_v33, 0.0  ;;  %v2320_v39 = vpop.eup %2031  ;;  %v2010_v35 = vld [vmem:[%s2426_s4 + $0x18] sm:$0xff]  }
 0x32f   : > { %v1066_v36 = vpack.c.bf16 %v1058_v32, %v1058_v32  ;;  %v1047_v40 = vsel %vm977_vm3, %v2320_v39, 0.0 }
 0x331   : > { %1892 = vmatmul.mubr.msk.bf16.vlgmr.msra.gmra.mrb[12].mxu0 %vm977_vm3, %v1066_v36 }
 0x332   : > { %1902 = vmatpush3.bf16.msra.mxu0 %v1171_v37  ;;  %1042 = vadd.xlane.f32.xlu0 %v1041_v38 }
 0x333   : > { %1903 = vmatprep.mubr.msk.bf16.mxu0 %vm2057_vm0, %v2056_v4  ;;  %1913 = vmatprep.subr.bf16.mxu0 %v2056_v4 }
 0x336   : > { %1048 = vadd.xlane.f32.xlu0 %v1047_v40  ;;  %v2011_v40 = vld [vmem:[%s2426_s4 + $0x20] sm:$0xff]  }
 0x33f   : > { %596 = vrot.lane.b32.xlu1 %v2238_v41, %s2063_s26 }
 0x34c   : > { %598 = vrot.lane.b32.xlu0 %v2238_v41, %s2064_s27 }
 0x37a   : > { %v1031_v42 = vpop.xlane.xlu0 %1030 }
 0x37b   : > { %2033 = vrcp.f32 %v1031_v42  ;;  %v2012_v42 = vld [vmem:[%s2426_s4 + $0x28] sm:$0xff]  }
 0x382   : > { %v1040_v43 = vpop.xlane.xlu1 %1039 }
 0x385   : > { %v2034_v44 = vpop.eup %2033 }
 0x386   : > { %v1059_v45 = vmul.f32 %v2034_v44, %v2018_v5  ;;  %v1034_v46 = vpop.xlane.xlu1 %1033  ;;  %v2014_v44 = vld [vmem:[%s2426_s4 + $0x38] sm:$0xff]  }
 0x387   : > { %2035 = vrcp.f32 %v1034_v46 }
 0x388   : > { %v1067_v47 = vpack.c.bf16 %v1059_v45, %v1059_v45 }
 0x38a   : > { %1898 = vmatmul.mubr.msk.bf16.vlgmr.msra.gmra.mrb[28].mxu1 %vm977_vm3, %v1067_v47  ;;  %v1037_v49 = vpop.xlane.xlu0 %1036  ;;  %v593_v51 = vpop.permute.xlu1 %592 }
 0x38b   : > { %2037 = vrcp.f32 %v1037_v49  ;;  %1908 = vmatpush3.bf16.msra.mxu1 %v1217_v48  ;;  %1909 = vmatprep.mubr.msk.bf16.mxu1 %vm2057_vm0, %v2056_v4  ;;  %v1263_v56 = vsel %vm1077_vm2, %v593_v51, 0 }
 0x38c   : > { %2039 = vrcp.f32 %v1040_v43  ;;  %1919 = vmatprep.subr.bf16.mxu1 %v2056_v4  ;;  %v2013_v43 = vld [vmem:[%s2426_s4 + $0x30] sm:$0xff]  }
 0x38e   : > { %v595_v57 = vpop.permute.xlu0 %594 }
 0x38f   : > { %v1309_v60 = vsel %vm1077_vm2, %v595_v57, 0 }
 0x391   : > { %v2036_v41 = vpop.eup %2035 }
 0x392   : > { %v1060_v50 = vmul.f32 %v2036_v41, %v2022_v14 }
 0x394   : > { %v1068_v53 = vpack.c.bf16 %v1060_v50, %v1060_v50 }
 0x395   : > { %v2038_v52 = vpop.eup %2037 }
 0x396   : > { %v2040_v54 = vpop.eup %2039  ;;  %v1061_v55 = vmul.f32 %v2038_v52, %v2024_v16  ;;  %1904 = vmatmul.mubr.msk.bf16.vlgmr.msra.gmra.mrb[16].mxu0 %vm977_vm3, %v1068_v53 }
 0x397   : > { %1914 = vmatpush3.bf16.msra.mxu0 %v1263_v56  ;;  %1915 = vmatprep.mubr.msk.bf16.mxu0 %vm2057_vm0, %v2056_v4  ;;  %v1062_v59 = vmul.f32 %v2040_v54, %v2299_v12 }
 0x398   : > { %v1069_v58 = vpack.c.bf16 %v1061_v55, %v1061_v55  ;;  %1925 = vmatprep.subr.bf16.mxu0 %v2056_v4 }
 0x399   : > { %v1070_v61 = vpack.c.bf16 %v1062_v59, %v1062_v59 }
 0x39a   : > { %1910 = vmatmul.mubr.msk.bf16.vlgmr.msra.gmra.mrb[32].mxu1 %vm977_vm3, %v1069_v58 }
 0x39b   : > { %1920 = vmatpush3.bf16.msra.mxu1 %v1309_v60  ;;  %1921 = vmatprep.mubr.msk.bf16.mxu1 %vm2057_vm0, %v2056_v4 }
 0x39c   : > { %1931 = vmatprep.subr.bf16.mxu1 %v2056_v4 }
 0x39e   : > { %1916 = vmatmul.mubr.msk.bf16.vlgmr.msra.gmra.mrb[20].mxu0 %vm977_vm3, %v1070_v61 }
 0x39f   : > { %1927 = vmatprep.mubr.msk.bf16.mxu0 %vm2057_vm0, %v2056_v4 }
 0x3bb   : > { %v1046_v62 = vpop.xlane.xlu1 %1045 }
 0x3bc   : > { %2041 = vrcp.f32 %v1046_v62 }
 0x3bf   : > { %v1043_v63 = vpop.xlane.xlu0 %1042  ;;  %v597_v0 = vpop.permute.xlu1 %596 }
 0x3c0   : > { %2043 = vrcp.f32 %v1043_v63  ;;  %v1355_v1 = vsel %vm1077_vm2, %v597_v0, 0 }
 0x3c1   : > { %1926 = vmatpush3.bf16.msra.mxu0 %v1355_v1 }
 0x3c2   : > { %1937 = vmatprep.subr.bf16.mxu0 %v2056_v4 }
 0x3c3   : > { %v1049_v2 = vpop.xlane.xlu0 %1048 }
 0x3c4   : > { %2045 = vrcp.f32 %v1049_v2 }
 0x3c6   : > { %v2042_v3 = vpop.eup %2041 }
 0x3c7   : > { %v1064_v6 = vmul.f32 %v2042_v3, %v2310_v30  ;;  %v599_v9 = vpop.permute.xlu0 %598 }
 0x3c8   : > { %v1401_v12 = vsel %vm1077_vm2, %v599_v9, 0 }
 0x3c9   : > { %v1072_v5 = vpack.c.bf16 %v1064_v6, %v1064_v6 }
 0x3ca   : > { %v2044_v7 = vpop.eup %2043 }
 0x3cb   : > { %v1063_v8 = vmul.f32 %v2044_v7, %v2312_v33  ;;  %1928 = vmatmul.mubr.msk.bf16.vlgmr.msra.gmra.mrb[24].mxu0 %vm977_vm3, %v1072_v5 }
 0x3cc   : > { %1953 = vmatprep.mubr.msk.bf16.mxu0 %vm2057_vm0, %v2056_v4  ;;  %1938 = vmatpush3.bf16.msra.mxu0 %v2007_v23 }
 0x3cd   : > { %v1071_v10 = vpack.c.bf16 %v1063_v8, %v1063_v8  ;;  %1939 = vmatprep.subr.bf16.mxu0 %v2056_v4 }
 0x3ce   : > { %v2046_v11 = vpop.eup %2045 }
 0x3cf   : > { %1922 = vmatmul.mubr.msk.bf16.vlgmr.msra.gmra.mrb[36].mxu1 %vm977_vm3, %v1071_v10  ;;  %v1065_v13 = vmul.f32 %v2046_v11, %v2320_v39 }
 0x3d0   : > { %1932 = vmatpush3.bf16.msra.mxu1 %v1401_v12  ;;  %1933 = vmatprep.mubr.msk.bf16.mxu1 %vm2057_vm0, %v2056_v4 }
 0x3d1   : > { %v1073_v14 = vpack.c.bf16 %v1065_v13, %v1065_v13  ;;  %1940 = vmatpush3.bf16.msra.mxu0 %v2008_v24 }
 0x3d2   : > { %1941 = vmatprep.subr.bf16.mxu0 %v2056_v4 }
 0x3d5   : > { %1942 = vmatpush3.bf16.msra.mxu0 %v2009_v29 }
 0x3d6   : > { %1943 = vmatprep.subr.bf16.mxu0 %v2056_v4 }
 0x3d7   : > { %1934 = vmatmul.mubr.msk.bf16.vlgmr.msra.gmra.mrb[40].mxu1 %vm977_vm3, %v1073_v14 }
 0x3d9   : > { %1944 = vmatpush3.bf16.msra.mxu0 %v2010_v35 }
 0x3da   : > { %1945 = vmatprep.subr.bf16.mxu0 %v2056_v4 }
 0x3dd   : > { %1946 = vmatpush3.bf16.msra.mxu0 %v2011_v40 }
 0x3de   : > { %1947 = vmatprep.subr.bf16.mxu0 %v2056_v4 }
 0x3e1   : > { %1948 = vmatpush3.bf16.msra.mxu0 %v2012_v42 }
 0x3e2   : > { %1949 = vmatprep.subr.bf16.mxu0 %v2056_v4 }
 0x3e5   : > { %1950 = vmatpush3.bf16.msra.mxu0 %v2013_v43 }
 0x3e6   : > { %1951 = vmatprep.subr.bf16.mxu0 %v2056_v4 }
 0x3e9   : > { %1952 = vmatpush3.bf16.msra.mxu0 %v2014_v44 }
 0x404   : > { %v2363_v15 = vpop.f32.mrb[12].mxu0 }
 0x405   : > { %v1893_v16 = vpop.f32.mrb[13].mxu0 }
 0x406   : > { %v1118_v17 = vpop.f32.mrb[14].mxu0 }
 0x407   : > { %v1894_v18 = vpop.f32.mrb[15].mxu0 }
 0x45d   : > { %v1161_v19 = vpop.f32.mrb[28].mxu1 }
 0x45e   : > { %v1899_v20 = vpop.f32.mrb[29].mxu1  ;;  %1444 = vrot.lane.b32.xlu1 %v1161_v19, %s2064_s27 }
 0x45f   : > { %v1164_v21 = vpop.f32.mrb[30].mxu1 }
 0x460   : > { %v1900_v22 = vpop.f32.mrb[31].mxu1 }
 0x469   : > { %v1207_v25 = vpop.f32.mrb[16].mxu0 }
 0x46a   : > { %1448 = vrot.lane.b32.xlu0 %v1207_v25, %s2063_s26  ;;  %v1905_v27 = vpop.f32.mrb[17].mxu0 }
 0x46b   : > { %v1210_v28 = vpop.f32.mrb[18].mxu0 }
 0x46c   : > { %v1906_v30 = vpop.f32.mrb[19].mxu0 }
 0x46d   : > { %v1253_v31 = vpop.f32.mrb[32].mxu1 }
 0x46e   : > { %1452 = vrot.lane.b32.xlu1 %v1253_v31, %s2062_s23  ;;  %v1911_v32 = vpop.f32.mrb[33].mxu1 }
 0x46f   : > { %v1256_v33 = vpop.f32.mrb[34].mxu1 }
 0x470   : > { %v1912_v34 = vpop.f32.mrb[35].mxu1 }
 0x471   : > { %v1299_v36 = vpop.f32.mrb[20].mxu0 }
 0x472   : > { %1456 = vrot.lane.b32.xlu0 %v1299_v36, %s2060_s21  ;;  %v1917_v37 = vpop.f32.mrb[21].mxu0 }
 0x473   : > { %v1302_v38 = vpop.f32.mrb[22].mxu0 }
 0x474   : > { %v1918_v39 = vpop.f32.mrb[23].mxu0 }
 0x49e   : > { %v1391_v45 = vpop.f32.mrb[24].mxu0 }
 0x49f   : > { %1464 = vrot.lane.b32.xlu0 %v1391_v45, %s2058_s19  ;;  %v1929_v46 = vpop.f32.mrb[25].mxu0 }
 0x4a0   : > { %v1394_v47 = vpop.f32.mrb[26].mxu0 }
 0x4a1   : > { %v1930_v48 = vpop.f32.mrb[27].mxu0 }
 0x4a2   : > { %v1345_v49 = vpop.f32.mrb[36].mxu1 }
 0x4a3   : > { %1460 = vrot.lane.b32.xlu1 %v1345_v49, %s2061_s22  ;;  %v1923_v41 = vpop.f32.mrb[37].mxu1  ;;  %s284_s22 = scalar_lea.vmem %s2427_s5, %s1717_s17 }
 0x4a4   : > { %v1348_v50 = vpop.f32.mrb[38].mxu1 }
 0x4a5   : > { %v1924_v51 = vpop.f32.mrb[39].mxu1 }
 0x4aa   : > { %v1437_v52 = vpop.f32.mrb[40].mxu1 }
 0x4ab   : > { %1468 = vrot.lane.b32.xlu1 %v1437_v52, %s2059_s20  ;;  %v1935_v4 = vpop.f32.mrb[41].mxu1 }
 0x4ac   : > { %v1440_v53 = vpop.f32.mrb[42].mxu1 }
 0x4ad   : > { %v1936_v54 = vpop.f32.mrb[43].mxu1 }
 0x4d0   : > { %v1445_v55 = vpop.permute.xlu1 %1444 }
 0x4d1   : > { %v1471_v58 = vsel %vm600_vm1, %v2363_v15, %v1445_v55 }
 0x4dc   : > { %v1449_v56 = vpop.permute.xlu0 %1448 }
 0x4dd   : > { %v1473_v60 = vsel %vm1472_vm4, %v1471_v58, %v1449_v56 }
 0x4e0   : > { %v1453_v57 = vpop.permute.xlu1 %1452 }
 0x4e1   : > { %v1475_v62 = vsel %vm1474_vm5, %v1473_v60, %v1453_v57 }
 0x4e4   : > { %v1457_v59 = vpop.permute.xlu0 %1456 }
 0x4e5   : > { %v1477_v63 = vsel %vm1476_vm6, %v1475_v62, %v1457_v59 }
 0x511   : > { %v1465_v1 = vpop.permute.xlu0 %1464 }
 0x515   : > { %v1461_v61 = vpop.permute.xlu1 %1460 }
 0x516   : > { %v1479_v0 = vsel %vm1478_vm7, %v1477_v63, %v1461_v61 }
 0x517   : > { %v1481_v3 = vsel %vm1480_vm8, %v1479_v0, %v1465_v1 }
 0x51d   : > { %v1469_v2 = vpop.permute.xlu1 %1468 }
 0x51e   : > { %v1483_v6 = vsel %vm1482_vm9, %v1481_v3, %v1469_v2 }
 0x51f   : > { %v1484_v7 = vpack.c.bf16 %v1483_v6, %v1483_v6 }
 0x521   : > { %1954 = vmatmul.mubr.bf16.vlgmr.msra.gmra.mrb[28].mxu0 %v1484_v7 }
 0x5f4   : > { %v1583_v5 = vpop.f32.mrb[28].mxu0 }
 0x5f5   : > { %v1589_v8 = vadd.f32 %v1583_v5, %v2188_v26  ;;  %v1955_v9 = vpop.f32.mrb[29].mxu0 }
 0x5f6   : > { %v1586_v10 = vpop.f32.mrb[30].mxu0 }
 0x5f7   : > { %v1590_v11 = vmax.f32 %v1589_v8, 0.0  ;;  %v1956_v12 = vpop.f32.mrb[31].mxu0 }
 0x5f9   : > { %v1591_v13 = vpack.c.bf16 %v1590_v11, %v1590_v11 }
 0x5fb   : > { %1592 = vst [vmem:[%s284_s22] sm:$0xf] %v1591_v13  ;;  %v1593_v14 = vunpack.c.l.bf16 %v1591_v13 }
 0x5fd   : > { %v1594_v15 = vrot.slane %v1593_v14, 4  ;;  %v1601_v16 = vmul.f32 %v1593_v14, %v1593_v14 }
 0x5ff   : > { %v1595_v17 = vadd.f32 %v1594_v15, %v1593_v14  ;;  %v1602_v18 = vrot.slane %v1601_v16, 4 }
 0x601   : > { %v1596_v19 = vrot.slane %v1595_v17, 2  ;;  %v1603_v26 = vadd.f32 %v1602_v18, %v1601_v16 }
 0x603   : > { %v1597_v20 = vadd.f32 %v1596_v19, %v1595_v17  ;;  %v1604_v21 = vrot.slane %v1603_v26, 2 }
 0x605   : > { %v1598_v22 = vrot.slane %v1597_v20, 1  ;;  %v1605_v23 = vadd.f32 %v1604_v21, %v1603_v26 }
 0x607   : > { %v1599_v24 = vadd.f32 %v1598_v22, %v1597_v20  ;;  %v1606_v25 = vrot.slane %v1605_v23, 1 }
 0x609   : > { %1600 = vst [vmem:[%s287_s29] sm:$0x1] %v1599_v24  ;;  %v1607_v27 = vadd.f32 %v1606_v25, %v1605_v23 }
 0x60b   : > { %1608 = vst [vmem:[%s290_s8] sm:$0x1] %v1607_v27 }
 0x60c PF: > { %s18_s24 = sadd.s32 1, %s2053_s24  }
 0x60d   : > { %p15_p4 = scmp.ge.s32.totalorder %s18_s24, 4  }
 0x60f   :  { %17 = sbr.rel (!%p15_p4) target bundleno = 1 (0x1), region = 94 }

</bundles_post_ra>
